<compile_context>
chip_gen: v6e
topology: v6e:2x2x1
jax: 0.10.0
libtpu: 0.0.40
codegen_flags: <defaults>
</compile_context>

<pallas_src>
import math

import jax
import jax.numpy as jnp
from jax.experimental import pallas as pl
from jax.experimental.pallas import tpu as pltpu


def _round_up(a, b):
    return (a + b - 1) // b * b


def _ff_slow_kernel(x_ref, *refs):
    """Fused MLP on one batch tile.

    x_ref : (tile_m, num_ins)  f32, VMEM (pipelined over the batch grid)
    refs  : w1, b1, ..., wN, bN (whole arrays, VMEM-resident), then o_ref.
            wK: (in_k, out_k) in matmul dtype; bK: (1, out_k) f32.
    o_ref : (tile_m, padded_outs)  -- lane-dense (last dim multiple of 128).
    """
    o_ref = refs[-1]
    wb = refs[:-1]
    n_layers = len(wb) // 2

    h = x_ref[...]                                  # f32 activations
    for li in range(n_layers):
        w_ref = wb[2 * li]
        b_ref = wb[2 * li + 1]
        # Matmul operands may be bf16; accumulation is always f32 on the MXU.
        h = jnp.dot(h.astype(w_ref.dtype), w_ref[...],
                    preferred_element_type=jnp.float32) + b_ref[...]
        if li < n_layers - 1:                       # ReLU on hidden layers only
            h = jnp.maximum(h, 0.0)                 # f32 VPU math (v5e-safe)
    o_ref[...] = h.astype(o_ref.dtype)


def ff_slow_net_pallas(x, params, *, tile_m=512, matmul_dtype=jnp.float32,
                       out_lane=128):
    """params: list of (W, b) with W shaped (in, out), b shaped (out,).

    Computes y = relu(...relu(x @ W1 + b1)...) @ Wn + bn, identical to
    PyTorch FFSlowNet.forward (weights pre-transposed to (in, out))."""
    batch, num_ins = x.shape
    num_outs = params[-1][0].shape[1]

    # --- batch tiling: one big tile (whole batch when small), 8-row aligned.
    tile = min(tile_m, _round_up(batch, 8))
    tile = _round_up(tile, 8)
    padded_batch = _round_up(batch, tile)
    if padded_batch != batch:
        x = jnp.pad(x, ((0, padded_batch - batch), (0, 0)))
    grid = (padded_batch // tile,)

    # --- lane-dense output: pad final layer out-dim to a multiple of 128.
    padded_outs = _round_up(num_outs, out_lane)

    flat_args = []
    in_specs = [pl.BlockSpec((tile, num_ins), lambda i: (i, 0))]
    # Grid-invariant operands: whole arrays resident in VMEM (no pipelining,
    # no double-buffered second copy of each weight).
    resident = pl.BlockSpec(memory_space=pltpu.MemorySpace.VMEM)

    n_layers = len(params)
    flops = 0
    bytes_accessed = int(x.size) * x.dtype.itemsize
    for li, (w, b) in enumerate(params):
        if li == n_layers - 1 and padded_outs != num_outs:
            w = jnp.pad(w, ((0, 0), (0, padded_outs - num_outs)))
            b = jnp.pad(b, ((0, padded_outs - num_outs),))
        w = w.astype(matmul_dtype)                   # halves DMA bytes if bf16
        b = b.reshape(1, -1).astype(jnp.float32)     # bias add stays f32
        flat_args += [w, b]
        in_specs += [resident, resident]
        flops += 2 * padded_batch * int(w.shape[0]) * int(w.shape[1])
        bytes_accessed += int(w.size) * w.dtype.itemsize
        bytes_accessed += int(b.size) * b.dtype.itemsize
    bytes_accessed += padded_batch * padded_outs * x.dtype.itemsize

    out = pl.pallas_call(
        _ff_slow_kernel,
        out_shape=jax.ShapeDtypeStruct((padded_batch, padded_outs), x.dtype),
        grid_spec=pltpu.PrefetchScalarGridSpec(
            num_scalar_prefetch=0,
            grid=grid,
            in_specs=in_specs,
            out_specs=pl.BlockSpec((tile, padded_outs), lambda i: (i, 0)),
        ),
        compiler_params=pltpu.CompilerParams(
            dimension_semantics=("parallel",),
            vmem_limit_bytes=48 * 1024 * 1024,
        ),
        cost_estimate=pl.CostEstimate(
            flops=flops, transcendentals=0, bytes_accessed=bytes_accessed),
    )(x, *flat_args)

    return out[:batch, :num_outs]


def ff_slow_net_ref(x, params):
    """Pure-JAX reference matching PyTorch FFSlowNet.forward semantics."""
    h = x
    for (w, b) in params[:-1]:
        h = jnp.maximum(h @ w + b, 0.0)
    w, b = params[-1]
    return h @ w + b


def init_params(key, num_ins, num_outs, hid_shapes):
    """Deterministic init mimicking torch.nn.Linear default (uniform +/- 1/sqrt(fan_in)).
    Weights stored transposed as (in_features, out_features)."""
    dims = [num_ins] + list(hid_shapes) + [num_outs]
    params = []
    for fan_in, fan_out in zip(dims[:-1], dims[1:]):
        key, kw, kb = jax.random.split(key, 3)
        bound = 1.0 / math.sqrt(fan_in)
        w = jax.random.uniform(kw, (fan_in, fan_out), jnp.float32, -bound, bound)
        b = jax.random.uniform(kb, (fan_out,), jnp.float32, -bound, bound)
        params.append((w, b))
    return params


if __name__ == "__main__":
    # Small shapes consistent with the module (default hid_shapes).
    batch = 16
    num_ins = 32
    hid_shapes = (256, 512, 1024)
    num_outs = 16

    key = jax.random.PRNGKey(0)
    key, kx = jax.random.split(key)
    x = jax.random.normal(kx, (batch, num_ins), jnp.float32)
    params = init_params(key, num_ins, num_outs, hid_shapes)

    ref = ff_slow_net_ref(x, params)

    # f32 path: whole batch in a single grid step, lane-dense padded output.
    out = ff_slow_net_pallas(x, params, tile_m=512, matmul_dtype=jnp.float32)
    out = jax.block_until_ready(out)
    assert out.shape == (batch, num_outs)
    assert jnp.allclose(out, ref, atol=2e-3, rtol=2e-3), (
        f"f32 max abs err {jnp.max(jnp.abs(out - ref))}")

    # bf16 matmul operands (v6e/v7x MXU fast path), f32 accumulation/bias/ReLU.
    out_bf16 = ff_slow_net_pallas(x, params, tile_m=512,
                                  matmul_dtype=jnp.bfloat16)
    out_bf16 = jax.block_until_ready(out_bf16)
    assert out_bf16.shape == (batch, num_outs)
    assert float(jnp.max(jnp.abs(out_bf16 - ref))) < 0.1, (
        f"bf16 max abs err {jnp.max(jnp.abs(out_bf16 - ref))}")

    # Larger batch that is not a tile multiple: exercises the batch grid and
    # the padding/slicing path.
    batch2 = 600
    key, kx2 = jax.random.split(key)
    x2 = jax.random.normal(kx2, (batch2, num_ins), jnp.float32)
    out2 = ff_slow_net_pallas(x2, params, tile_m=256, matmul_dtype=jnp.float32)
    out2 = jax.block_until_ready(out2)
    ref2 = ff_slow_net_ref(x2, params)
    assert out2.shape == (batch2, num_outs)
    assert jnp.allclose(out2, ref2, atol=2e-3, rtol=2e-3), (
        f"f32 grid max abs err {jnp.max(jnp.abs(out2 - ref2))}")

    print("KERNEL_OK")
</pallas_src>

<mosaic_0001>
module attributes {stable_mosaic.version = 11 : i64} {
  func.func @_ff_slow_kernel(%arg0: i32, %arg1: memref<16x32xf32, #tpu.memory_space<vmem>>, %arg2: memref<32x256xf32, #tpu.memory_space<vmem>>, %arg3: memref<1x256xf32, #tpu.memory_space<vmem>>, %arg4: memref<256x512xf32, #tpu.memory_space<vmem>>, %arg5: memref<1x512xf32, #tpu.memory_space<vmem>>, %arg6: memref<512x1024xf32, #tpu.memory_space<vmem>>, %arg7: memref<1x1024xf32, #tpu.memory_space<vmem>>, %arg8: memref<1024x128xf32, #tpu.memory_space<vmem>>, %arg9: memref<1x128xf32, #tpu.memory_space<vmem>>, %arg10: memref<16x128xf32, #tpu.memory_space<vmem>>) attributes {dimension_semantics = [#tpu.dimension_semantics<parallel>], iteration_bounds = array<i64: 1>, scalar_prefetch = 0 : i64, scratch_operands = 0 : i64, tpu.core_type = #tpu.core_type<tc>, window_params = [{transform_indices = @transform_0, window_bounds = array<i64: 16, 32>}, {pipeline_mode = #tpu.pipeline_mode<synchronous>, transform_indices = @transform_1, window_bounds = array<i64: 32, 256>}, {pipeline_mode = #tpu.pipeline_mode<synchronous>, transform_indices = @transform_2, window_bounds = array<i64: 1, 256>}, {pipeline_mode = #tpu.pipeline_mode<synchronous>, transform_indices = @transform_3, window_bounds = array<i64: 256, 512>}, {pipeline_mode = #tpu.pipeline_mode<synchronous>, transform_indices = @transform_4, window_bounds = array<i64: 1, 512>}, {pipeline_mode = #tpu.pipeline_mode<synchronous>, transform_indices = @transform_5, window_bounds = array<i64: 512, 1024>}, {pipeline_mode = #tpu.pipeline_mode<synchronous>, transform_indices = @transform_6, window_bounds = array<i64: 1, 1024>}, {pipeline_mode = #tpu.pipeline_mode<synchronous>, transform_indices = @transform_7, window_bounds = array<i64: 1024, 128>}, {pipeline_mode = #tpu.pipeline_mode<synchronous>, transform_indices = @transform_8, window_bounds = array<i64: 1, 128>}, {transform_indices = @transform_9, window_bounds = array<i64: 16, 128>}]} {
    %c0 = arith.constant 0 : index
    %c0_0 = arith.constant 0 : index
    %0 = vector.load %arg1[%c0, %c0_0] : memref<16x32xf32, #tpu.memory_space<vmem>>, vector<16x32xf32>
    %c0_1 = arith.constant 0 : index
    %c0_2 = arith.constant 0 : index
    %1 = vector.load %arg2[%c0_1, %c0_2] : memref<32x256xf32, #tpu.memory_space<vmem>>, vector<32x256xf32>
    %cst = arith.constant dense<0.000000e+00> : vector<16x256xf32>
    %2 = tpu.matmul %0, %1, %cst {dimension_numbers = #tpu.dot_dimension_numbers<[1], [0], [0], [1], [0, 0, 1, 1], [], []>} : vector<16x32xf32>, vector<32x256xf32>, vector<16x256xf32> -> vector<16x256xf32>
    %c0_3 = arith.constant 0 : index
    %c0_4 = arith.constant 0 : index
    %3 = vector.load %arg3[%c0_3, %c0_4] : memref<1x256xf32, #tpu.memory_space<vmem>>, vector<1x256xf32>
    %4 = vector.broadcast %3 : vector<1x256xf32> to vector<16x256xf32>
    %5 = arith.addf %2, %4 : vector<16x256xf32>
    %cst_5 = arith.constant 0.000000e+00 : f32
    %6 = vector.broadcast %cst_5 : f32 to vector<16x256xf32>
    %7 = arith.maximumf %5, %6 : vector<16x256xf32>
    %c0_6 = arith.constant 0 : index
    %c0_7 = arith.constant 0 : index
    %8 = vector.load %arg4[%c0_6, %c0_7] : memref<256x512xf32, #tpu.memory_space<vmem>>, vector<256x512xf32>
    %cst_8 = arith.constant dense<0.000000e+00> : vector<16x512xf32>
    %9 = tpu.matmul %7, %8, %cst_8 {dimension_numbers = #tpu.dot_dimension_numbers<[1], [0], [0], [1], [0, 0, 1, 1], [], []>} : vector<16x256xf32>, vector<256x512xf32>, vector<16x512xf32> -> vector<16x512xf32>
    %c0_9 = arith.constant 0 : index
    %c0_10 = arith.constant 0 : index
    %10 = vector.load %arg5[%c0_9, %c0_10] : memref<1x512xf32, #tpu.memory_space<vmem>>, vector<1x512xf32>
    %11 = vector.broadcast %10 : vector<1x512xf32> to vector<16x512xf32>
    %12 = arith.addf %9, %11 : vector<16x512xf32>
    %cst_11 = arith.constant 0.000000e+00 : f32
    %13 = vector.broadcast %cst_11 : f32 to vector<16x512xf32>
    %14 = arith.maximumf %12, %13 : vector<16x512xf32>
    %c0_12 = arith.constant 0 : index
    %c0_13 = arith.constant 0 : index
    %15 = vector.load %arg6[%c0_12, %c0_13] : memref<512x1024xf32, #tpu.memory_space<vmem>>, vector<512x1024xf32>
    %cst_14 = arith.constant dense<0.000000e+00> : vector<16x1024xf32>
    %16 = tpu.matmul %14, %15, %cst_14 {dimension_numbers = #tpu.dot_dimension_numbers<[1], [0], [0], [1], [0, 0, 1, 1], [], []>} : vector<16x512xf32>, vector<512x1024xf32>, vector<16x1024xf32> -> vector<16x1024xf32>
    %c0_15 = arith.constant 0 : index
    %c0_16 = arith.constant 0 : index
    %17 = vector.load %arg7[%c0_15, %c0_16] : memref<1x1024xf32, #tpu.memory_space<vmem>>, vector<1x1024xf32>
    %18 = vector.broadcast %17 : vector<1x1024xf32> to vector<16x1024xf32>
    %19 = arith.addf %16, %18 : vector<16x1024xf32>
    %cst_17 = arith.constant 0.000000e+00 : f32
    %20 = vector.broadcast %cst_17 : f32 to vector<16x1024xf32>
    %21 = arith.maximumf %19, %20 : vector<16x1024xf32>
    %c0_18 = arith.constant 0 : index
    %c0_19 = arith.constant 0 : index
    %22 = vector.load %arg8[%c0_18, %c0_19] : memref<1024x128xf32, #tpu.memory_space<vmem>>, vector<1024x128xf32>
    %cst_20 = arith.constant dense<0.000000e+00> : vector<16x128xf32>
    %23 = tpu.matmul %21, %22, %cst_20 {dimension_numbers = #tpu.dot_dimension_numbers<[1], [0], [0], [1], [0, 0, 1, 1], [], []>} : vector<16x1024xf32>, vector<1024x128xf32>, vector<16x128xf32> -> vector<16x128xf32>
    %c0_21 = arith.constant 0 : index
    %c0_22 = arith.constant 0 : index
    %24 = vector.load %arg9[%c0_21, %c0_22] : memref<1x128xf32, #tpu.memory_space<vmem>>, vector<1x128xf32>
    %25 = vector.broadcast %24 : vector<1x128xf32> to vector<16x128xf32>
    %26 = arith.addf %23, %25 : vector<16x128xf32>
    %c0_23 = arith.constant 0 : index
    %c0_24 = arith.constant 0 : index
    %27 = vector.load %arg10[%c0_23, %c0_24] : memref<16x128xf32, #tpu.memory_space<vmem>>, vector<16x128xf32>
    tpu.vector_store %arg10[%c0_23, %c0_24], %26 {strides = array<i32>} : memref<16x128xf32, #tpu.memory_space<vmem>>, vector<16x128xf32>,
    return
  }
  func.func @transform_0(%arg0: i32) -> (i32, i32) {
    %c0_i32 = arith.constant 0 : i32
    %c0_i32_0 = arith.constant 0 : i32
    return %arg0, %c0_i32 : i32, i32
  }
  func.func @transform_1(%arg0: i32) -> (i32, i32) {
    %c0_i32 = arith.constant 0 : i32
    %c0_i32_0 = arith.constant 0 : i32
    %c0_i32_1 = arith.constant 0 : i32
    return %c0_i32, %c0_i32_0 : i32, i32
  }
  func.func @transform_2(%arg0: i32) -> (i32, i32) {
    %c0_i32 = arith.constant 0 : i32
    %c0_i32_0 = arith.constant 0 : i32
    %c0_i32_1 = arith.constant 0 : i32
    return %c0_i32, %c0_i32_0 : i32, i32
  }
  func.func @transform_3(%arg0: i32) -> (i32, i32) {
    %c0_i32 = arith.constant 0 : i32
    %c0_i32_0 = arith.constant 0 : i32
    %c0_i32_1 = arith.constant 0 : i32
    return %c0_i32, %c0_i32_0 : i32, i32
  }
  func.func @transform_4(%arg0: i32) -> (i32, i32) {
    %c0_i32 = arith.constant 0 : i32
    %c0_i32_0 = arith.constant 0 : i32
    %c0_i32_1 = arith.constant 0 : i32
    return %c0_i32, %c0_i32_0 : i32, i32
  }
  func.func @transform_5(%arg0: i32) -> (i32, i32) {
    %c0_i32 = arith.constant 0 : i32
    %c0_i32_0 = arith.constant 0 : i32
    %c0_i32_1 = arith.constant 0 : i32
    return %c0_i32, %c0_i32_0 : i32, i32
  }
  func.func @transform_6(%arg0: i32) -> (i32, i32) {
    %c0_i32 = arith.constant 0 : i32
    %c0_i32_0 = arith.constant 0 : i32
    %c0_i32_1 = arith.constant 0 : i32
    return %c0_i32, %c0_i32_0 : i32, i32
  }
  func.func @transform_7(%arg0: i32) -> (i32, i32) {
    %c0_i32 = arith.constant 0 : i32
    %c0_i32_0 = arith.constant 0 : i32
    %c0_i32_1 = arith.constant 0 : i32
    return %c0_i32, %c0_i32_0 : i32, i32
  }
  func.func @transform_8(%arg0: i32) -> (i32, i32) {
    %c0_i32 = arith.constant 0 : i32
    %c0_i32_0 = arith.constant 0 : i32
    %c0_i32_1 = arith.constant 0 : i32
    return %c0_i32, %c0_i32_0 : i32, i32
  }
  func.func @transform_9(%arg0: i32) -> (i32, i32) {
    %c0_i32 = arith.constant 0 : i32
    %c0_i32_0 = arith.constant 0 : i32
    return %arg0, %c0_i32 : i32, i32
  }
}

</mosaic_0001>

<bundles_post_ra>
// kernel: tpu_custom_call.1
= control target key start
LH: loop header
LB: loop body
LE: loop exit
PB: predicated region body
PF: predicated region fallthrough
CT: control target
= control target key end

     0   :  { %14 = vsyncpa [#allocation3], 0  ;;  %s2805_s0 = inlined_call_operand.hbm [shape: f32[16,32], index: 0, kind: input, shape index: {}]   ;;  %s2806_s1 = inlined_call_operand.hbm [shape: f32[32,256], index: 1, kind: input, shape index: {}]   ;;  %s2807_s2 = inlined_call_operand.hbm [shape: f32[1,256], index: 2, kind: input, shape index: {}]   ;;  %s2808_s3 = inlined_call_operand.hbm [shape: f32[256,512], index: 3, kind: input, shape index: {}]   ;;  %s2809_s4 = inlined_call_operand.hbm [shape: f32[1,512], index: 4, kind: input, shape index: {}]   ;;  %s2810_s5 = inlined_call_operand.hbm [shape: f32[512,1024], index: 5, kind: input, shape index: {}]   ;;  %s2811_s6 = inlined_call_operand.hbm [shape: f32[1,1024], index: 6, kind: input, shape index: {}]   ;;  %s2812_s7 = inlined_call_operand.hbm [shape: f32[1024,128], index: 7, kind: input, shape index: {}]   ;;  %s2813_s8 = inlined_call_operand.hbm [shape: f32[1,128], index: 8, kind: input, shape index: {}]   ;;  %s2814_s9 = inlined_call_operand.hbm [shape: f32[16,128], index: 9, kind: output, shape index: {}]  }
   0x1   :  { %15 = vsyncpa [#allocation6], 0 }
   0x2   :  { %16 = vsyncpa [#allocation9], 0 }
   0x3   :  { %17 = vsyncpa [#allocation12], 0 }
   0x4   :  { %18 = vsyncpa [#allocation15], 0 }
   0x5   :  { %19 = vsyncpa [#allocation4], 0  ;;  %s2599_s30 = smov [#allocation5]  }
   0x6   :  { %s37_s10 = sshll.u32 %s2599_s30, 4  ;;  %s38_s10 = int_to_ptr.vmem [resolvable:$true] %s37_s10 }
   0x7   :  { %s2395_s11 = scalar_lea.vmem %s38_s10, 1024  ;;  %p2400_p1 = scmp.lt.s32.totalorder %s38_s10, %s38_s10 }
   0x8   :  { %p2396_p0 = scmp.ne.s32.totalorder %s38_s10, %s2395_s11  ;;  %p2401_p2 = scmp.lt.s32.totalorder %s2395_s11, %s2395_s11 }
   0xa   :  { %p2402_p3 = por %p2401_p2, %p2400_p1 }
   0xc   :  { %p2403_p4 = pnand %p2402_p3, %p2396_p0 }
   0xe   :  { %2406 = shalt.err (!%p2403_p4)
}
   0xf   :  { %s2600_s12 = smov 256   ;;  %s2601_s13 = smov 16  }
  0x10   :  { %43 = dma.hbm_to_vmem [thread:$0]  %s2806_s1, 1024, %s38_s10, [#allocation6], %s2600_s12, %s2600_s12, %s2601_s13  }
  0x11   :  { %s2602_s16 = smov [#allocation8]  }
  0x12   :  { %s59_s17 = sshll.u32 %s2602_s16, 4  ;;  %s60_s17 = int_to_ptr.vmem [resolvable:$true] %s59_s17 }
  0x13   :  { %s2415_s18 = scalar_lea.vmem %s60_s17, 16384  ;;  %p2420_p6 = scmp.lt.s32.totalorder %s60_s17, %s60_s17 }
  0x14   :  { %p2416_p5 = scmp.ne.s32.totalorder %s60_s17, %s2415_s18  ;;  %p2421_p7 = scmp.lt.s32.totalorder %s2415_s18, %s2415_s18 }
  0x16   :  { %p2422_p8 = por %p2421_p7, %p2420_p6 }
  0x18   :  { %p2423_p9 = pnand %p2422_p8, %p2416_p5 }
  0x1a   :  { %2426 = shalt.err (!%p2423_p9)
}
  0x1b   :  { %s2603_s19 = smov 512   ;;  %s2604_s20 = smov 32  }
  0x1c   :  { %65 = dma.hbm_to_vmem [thread:$0]  %s2808_s3, 16384, %s60_s17, [#allocation9], %s2603_s19, %s2603_s19, %s2604_s20  }
  0x1d   :  { %s2605_s23 = smov [#allocation11]  }
  0x1e   :  { %s81_s24 = sshll.u32 %s2605_s23, 4  ;;  %s82_s24 = int_to_ptr.vmem [resolvable:$true] %s81_s24 }
  0x1f   :  { %s2435_s1 = scalar_lea.vmem %s82_s24, 65536  ;;  %p2440_p11 = scmp.lt.s32.totalorder %s82_s24, %s82_s24 }
  0x20   :  { %p2436_p10 = scmp.ne.s32.totalorder %s82_s24, %s2435_s1  ;;  %p2441_p12 = scmp.lt.s32.totalorder %s2435_s1, %s2435_s1 }
  0x22   :  { %p2442_p13 = por %p2441_p12, %p2440_p11 }
  0x24   :  { %p2443_p0 = pnand %p2442_p13, %p2436_p10 }
  0x26   :  { %2446 = shalt.err (!%p2443_p0)
}
  0x27   :  { %s2606_s25 = smov 1024   ;;  %s2607_s26 = smov 64  }
  0x28   :  { %87 = dma.hbm_to_vmem [thread:$0]  %s2810_s5, 65536, %s82_s24, [#allocation12], %s2606_s25, %s2606_s25, %s2607_s26  }
  0x29   :  { %s2608_s29 = smov [#allocation14]   ;;  %s2609_s3 = smov [#allocation2]  }
  0x2a   :  { %s103_s30 = sshll.u32 %s2608_s29, 4  ;;  %s25_s10 = sshll.u32 %s2609_s3, 4  ;;  %s104_s30 = int_to_ptr.vmem [resolvable:$true] %s103_s30  ;;  %s26_s10 = int_to_ptr.vmem [resolvable:$true] %s25_s10 }
  0x2b   :  { %s2455_s11 = scalar_lea.vmem %s104_s30, 16384  ;;  %p2460_p2 = scmp.lt.s32.totalorder %s104_s30, %s104_s30 }
  0x2c   :  { %p2456_p1 = scmp.ne.s32.totalorder %s104_s30, %s2455_s11  ;;  %p2461_p3 = scmp.lt.s32.totalorder %s2455_s11, %s2455_s11 }
  0x2e   :  { %p2462_p4 = por %p2461_p3, %p2460_p2 }
  0x30   :  { %p2463_p5 = pnand %p2462_p4, %p2456_p1 }
  0x32   :  { %2466 = shalt.err (!%p2463_p5)
}
  0x33   :  { %s2610_s12 = smov 128   ;;  %s2611_s13 = smov 8  }
  0x34   :  { %109 = dma.hbm_to_vmem [thread:$0]  %s2812_s7, 16384, %s104_s30, [#allocation15], %s2610_s12, %s2610_s12, %s2611_s13  }
  0x35   :  { %s2475_s5 = scalar_lea.vmem %s26_s10, 256  ;;  %p2480_p7 = scmp.lt.s32.totalorder %s26_s10, %s26_s10 }
  0x36   :  { %p2476_p6 = scmp.ne.s32.totalorder %s26_s10, %s2475_s5  ;;  %p2481_p8 = scmp.lt.s32.totalorder %s2475_s5, %s2475_s5 }
  0x38   :  { %p2482_p9 = por %p2481_p8, %p2480_p7 }
  0x3a   :  { %p2483_p10 = pnand %p2482_p9, %p2476_p6 }
  0x3c   :  { %2486 = shalt.err (!%p2483_p10)
}
  0x3d   :  { %31 = dma.hbm_to_vmem [thread:$0]  %s2805_s0, 256, %s26_s10, [#allocation3], %s2610_s12, %s2610_s12, %s2611_s13  }
  0x3e   :  { %s2612_s18 = smov [#allocation7]   ;;  %s2613_s20 = smov [#allocation10]  }
  0x3f   :  { %s50_s19 = sshll.u32 %s2612_s18, 4  ;;  %s72_s7 = sshll.u32 %s2613_s20, 4  ;;  %s51_s19 = int_to_ptr.vmem [resolvable:$true] %s50_s19  ;;  %s73_s7 = int_to_ptr.vmem [resolvable:$true] %s72_s7 }
  0x40   :  { %s2495_s21 = scalar_lea.vmem %s51_s19, 32  ;;  %p2500_p12 = scmp.lt.s32.totalorder %s51_s19, %s51_s19 }
  0x41   :  { %p2496_p11 = scmp.ne.s32.totalorder %s51_s19, %s2495_s21  ;;  %p2501_p13 = scmp.lt.s32.totalorder %s2495_s21, %s2495_s21 }
  0x43   :  { %p2502_p0 = por %p2501_p13, %p2500_p12 }
  0x45   :  { %p2503_p1 = pnand %p2502_p0, %p2496_p11 }
  0x47   :  { %2506 = shalt.err (!%p2503_p1)
}
  0x48   :  { %53 = dma.hbm_to_vmem [thread:$0]  %s2807_s2, 32, %s51_s19, [#allocation6]  }
  0x49   :  { %s2515_s24 = scalar_lea.vmem %s73_s7, 64  ;;  %p2520_p3 = scmp.lt.s32.totalorder %s73_s7, %s73_s7 }
  0x4a   :  { %p2516_p2 = scmp.ne.s32.totalorder %s73_s7, %s2515_s24  ;;  %p2521_p4 = scmp.lt.s32.totalorder %s2515_s24, %s2515_s24 }
  0x4c   :  { %p2522_p5 = por %p2521_p4, %p2520_p3 }
  0x4e   :  { %p2523_p6 = pnand %p2522_p5, %p2516_p2 }
  0x50   :  { %2526 = shalt.err (!%p2523_p6)
}
  0x51   :  { %75 = dma.hbm_to_vmem [thread:$0]  %s2809_s4, 64, %s73_s7, [#allocation9]  }
  0x52   :  { %s2614_s25 = smov [#allocation13]   ;;  %s2615_s27 = smov [#allocation16]  }
  0x53   :  { %s94_s26 = sshll.u32 %s2614_s25, 4  ;;  %s116_s28 = sshll.u32 %s2615_s27, 4  ;;  %s95_s26 = int_to_ptr.vmem [resolvable:$true] %s94_s26  ;;  %s117_s28 = int_to_ptr.vmem [resolvable:$true] %s116_s28 }
  0x54   :  { %s2535_s29 = scalar_lea.vmem %s95_s26, 128  ;;  %p2540_p8 = scmp.lt.s32.totalorder %s95_s26, %s95_s26 }
  0x55   :  { %p2536_p7 = scmp.ne.s32.totalorder %s95_s26, %s2535_s29  ;;  %p2541_p9 = scmp.lt.s32.totalorder %s2535_s29, %s2535_s29 }
  0x57   :  { %p2542_p10 = por %p2541_p9, %p2540_p8 }
  0x59   :  { %p2543_p11 = pnand %p2542_p10, %p2536_p7 }
  0x5b   :  { %2546 = shalt.err (!%p2543_p11)
}
  0x5c   :  { %97 = dma.hbm_to_vmem [thread:$0]  %s2811_s6, 128, %s95_s26, [#allocation12]  }
  0x5d   :  { %s2555_s3 = scalar_lea.vmem %s117_s28, 16  ;;  %s2559_s4 = scalar_lea.vmem %s117_s28, 32 }
  0x5e   :  { %p2556_p12 = scmp.ne.s32.totalorder %s117_s28, %s2555_s3  ;;  %p2560_p13 = scmp.lt.s32.totalorder %s117_s28, %s117_s28 }
  0x5f   :  { %p2561_p0 = scmp.lt.s32.totalorder %s2559_s4, %s2555_s3 }
  0x61   :  { %p2562_p1 = por %p2561_p0, %p2560_p13 }
  0x63   :  { %p2563_p2 = pnand %p2562_p1, %p2556_p12 }
  0x65   :  { %2566 = shalt.err (!%p2563_p2)
}
  0x66   :  { %119 = dma.hbm_to_vmem [thread:$0]  %s2813_s8, 16, %s117_s28, [#allocation15]  }
  0x67   :  { %2587 = dma.done.wait [#allocation3], 256  }
  0x68   :  { %2588 = vsyncadd [#allocation3], 4294967040 }
  0x69   :  { %2589 = dma.done.wait [#allocation6], 1056  }
  0x6a   :  { %2590 = vsyncadd [#allocation6], 4294966240 }
  0x6b   :  { %2591 = dma.done.wait [#allocation9], 16448  }
  0x6c   :  { %2592 = vsyncadd [#allocation9], 4294950848 }
  0x6d   :  { %2593 = dma.done.wait [#allocation12], 65664  }
  0x6e   :  { %2594 = vsyncadd [#allocation12], 4294901632 }
  0x6f   :  { %2595 = dma.done.wait [#allocation15], 16400  }
  0x70   :  { %2596 = vsyncadd [#allocation15], 4294950896  ;;  %v2616_v0 = vmov 0.0   ;;  %v156_v1 = vld [vmem:[#allocation5 + $0x38] sm:$0xff]  ;;  %v155_v2 = vld [vmem:[#allocation5 + $0x30] sm:$0xff]  ;;  %vm169_vm0 = vcmask 261120  }
  0x71   :  { %240 = vmatprep.mubr.f32.mxu0 %v2616_v0  ;;  %v154_v3 = vld [vmem:[#allocation5 + $0x28] sm:$0xff]  ;;  %200 = vmatprep.subr.mxu0 %v156_v1  ;;  %v153_v4 = vld [vmem:[#allocation5 + $0x20] sm:$0xff]  ;;  %v152_v5 = vld [vmem:[#allocation5 + $0x18] sm:$0xff]  ;;  %s2617_s6 = smov [#allocation17]  }
  0x72   :  { %201 = vmatpush1.msra.mxu0 %v155_v2  ;;  %v151_v6 = vld [vmem:[#allocation5 + $0x10] sm:$0xff]  ;;  %v150_v8 = vld [vmem:[#allocation5 + $0x8] sm:$0xff]  ;;  %v149_v11 = vld [vmem:[#allocation5] sm:$0xff]  ;;  %s2197_s8 = sshll.u32 %s2617_s6, 4  ;;  %s2198_s8 = int_to_ptr.vmem [resolvable:$true] %s2197_s8 }
  0x73   :  { %202 = vmatprep.subr.mxu0 %v154_v3  ;;  %v318_v7 = vld [vmem:[#allocation8 + $0x1e8] sm:$0xff]  ;;  %v317_v9 = vld [vmem:[#allocation8 + $0x1e0] sm:$0xff]  ;;  %v320_v14 = vld [vmem:[#allocation8 + $0x1f8] sm:$0xff]  ;;  %s2567_s14 = scalar_lea.vmem %s2198_s8, 256  ;;  %p2572_p4 = scmp.lt.s32.totalorder %s2198_s8, %s2198_s8 }
  0x74   :  { %203 = vmatpush1.msra.mxu0 %v153_v4  ;;  %407 = vmatprep.subr.mxu1 %v318_v7  ;;  %v314_v10 = vld [vmem:[#allocation8 + $0x1c8] sm:$0xff]  ;;  %v313_v12 = vld [vmem:[#allocation8 + $0x1c0] sm:$0xff]  ;;  %v319_v16 = vld [vmem:[#allocation8 + $0x1f0] sm:$0xff]  ;;  %p2568_p3 = scmp.ne.s32.totalorder %s2198_s8, %s2567_s14  ;;  %p2573_p5 = scmp.lt.s32.totalorder %s2567_s14, %s2567_s14 }
  0x75   :  { %204 = vmatprep.subr.mxu0 %v152_v5  ;;  %408 = vmatpush1.msra.mxu1 %v317_v9  ;;  %v147_v13 = vld [vmem:[#allocation2] sm:$0xff]  ;;  %v316_v17 = vld [vmem:[#allocation8 + $0x1d8] sm:$0xff]  ;;  %v309_v18 = vld [vmem:[#allocation8 + $0x1a0] sm:$0xff] }
  0x76   :  { %205 = vmatpush1.msra.mxu0 %v151_v6  ;;  %409 = vmatprep.subr.mxu1 %v314_v10  ;;  %v310_v15 = vld [vmem:[#allocation8 + $0x1a8] sm:$0xff]  ;;  %v315_v19 = vld [vmem:[#allocation8 + $0x1d0] sm:$0xff]  ;;  %v312_v22 = vld [vmem:[#allocation8 + $0x1b8] sm:$0xff]  ;;  %p2574_p6 = por %p2573_p5, %p2572_p4 }
  0x77   :  { %206 = vmatprep.subr.mxu0 %v150_v8  ;;  %410 = vmatpush1.msra.mxu1 %v313_v12  ;;  %v306_v20 = vld [vmem:[#allocation8 + $0x188] sm:$0xff]  ;;  %v148_v21 = vld [vmem:[#allocation2 + $0x8] sm:$0xff]  ;;  %v305_v24 = vld [vmem:[#allocation8 + $0x180] sm:$0xff] }
  0x78   :  { %207 = vmatpush1.msra.mxu0 %v149_v11  ;;  %411 = vmatprep.subr.mxu1 %v310_v15  ;;  %v311_v23 = vld [vmem:[#allocation8 + $0x1b0] sm:$0xff]  ;;  %v308_v25 = vld [vmem:[#allocation8 + $0x198] sm:$0xff]  ;;  %v302_v26 = vld [vmem:[#allocation8 + $0x168] sm:$0xff]  ;;  %p2575_p7 = pnand %p2574_p6, %p2568_p3 }
  0x79   :  { %2213 = vmatmul.mubr.msk.f32.vlgmr.msra.gmra.mxu0 %vm169_vm0, %v147_v13  ;;  %484 = vmatprep.subr.mxu0 %v320_v14  ;;  %v307_v27 = vld [vmem:[#allocation8 + $0x190] sm:$0xff]  ;;  %v301_v28 = vld [vmem:[#allocation8 + $0x160] sm:$0xff]  ;;  %v304_v29 = vld [vmem:[#allocation8 + $0x178] sm:$0xff] }
  0x7a   :  { %246 = vmatprep.mubr.f32.mxu0 %v2616_v0  ;;  %485 = vmatpush1.msra.mxu0 %v319_v16  ;;  %v298_v30 = vld [vmem:[#allocation8 + $0x148] sm:$0xff]  ;;  %v303_v31 = vld [vmem:[#allocation8 + $0x170] sm:$0xff]  ;;  %v297_v32 = vld [vmem:[#allocation8 + $0x140] sm:$0xff] }
  0x7b   :  { %486 = vmatprep.subr.mxu0 %v316_v17  ;;  %412 = vmatpush1.msra.mxu1 %v309_v18  ;;  %v300_v33 = vld [vmem:[#allocation8 + $0x158] sm:$0xff]  ;;  %v294_v34 = vld [vmem:[#allocation8 + $0x128] sm:$0xff]  ;;  %v299_v35 = vld [vmem:[#allocation8 + $0x150] sm:$0xff] }
  0x7c   :  { %487 = vmatpush1.msra.mxu0 %v315_v19  ;;  %413 = vmatprep.subr.mxu1 %v306_v20  ;;  %v293_v36 = vld [vmem:[#allocation8 + $0x120] sm:$0xff]  ;;  %v296_v37 = vld [vmem:[#allocation8 + $0x138] sm:$0xff]  ;;  %v290_v38 = vld [vmem:[#allocation8 + $0x108] sm:$0xff] }
  0x7d   :  { %2214 = vmatmul.mubr.msk.f32.gmra.mxu0 %vm169_vm0, %v148_v21  ;;  %488 = vmatprep.subr.mxu0 %v312_v22  ;;  %v295_v39 = vld [vmem:[#allocation8 + $0x130] sm:$0xff]  ;;  %v289_v40 = vld [vmem:[#allocation8 + $0x100] sm:$0xff]  ;;  %v292_v41 = vld [vmem:[#allocation8 + $0x118] sm:$0xff] }
  0x7e   :  { %489 = vmatpush1.msra.mxu0 %v311_v23  ;;  %414 = vmatpush1.msra.mxu1 %v305_v24  ;;  %v286_v42 = vld [vmem:[#allocation8 + $0xe8] sm:$0xff]  ;;  %v291_v43 = vld [vmem:[#allocation8 + $0x110] sm:$0xff]  ;;  %v285_v44 = vld [vmem:[#allocation8 + $0xe0] sm:$0xff] }
  0x7f   :  { %490 = vmatprep.subr.mxu0 %v308_v25  ;;  %415 = vmatprep.subr.mxu1 %v302_v26  ;;  %v288_v45 = vld [vmem:[#allocation8 + $0xf8] sm:$0xff]  ;;  %v282_v46 = vld [vmem:[#allocation8 + $0xc8] sm:$0xff]  ;;  %v287_v47 = vld [vmem:[#allocation8 + $0xf0] sm:$0xff] }
  0x80   :  { %491 = vmatpush1.msra.mxu0 %v307_v27  ;;  %416 = vmatpush1.msra.mxu1 %v301_v28  ;;  %v281_v48 = vld [vmem:[#allocation8 + $0xc0] sm:$0xff]  ;;  %v284_v49 = vld [vmem:[#allocation8 + $0xd8] sm:$0xff]  ;;  %v278_v50 = vld [vmem:[#allocation8 + $0xa8] sm:$0xff] }
  0x81   :  { %492 = vmatprep.subr.mxu0 %v304_v29  ;;  %417 = vmatprep.subr.mxu1 %v298_v30  ;;  %v283_v51 = vld [vmem:[#allocation8 + $0xd0] sm:$0xff]  ;;  %v277_v52 = vld [vmem:[#allocation8 + $0xa0] sm:$0xff]  ;;  %v280_v53 = vld [vmem:[#allocation8 + $0xb8] sm:$0xff] }
  0x82   :  { %493 = vmatpush1.msra.mxu0 %v303_v31  ;;  %418 = vmatpush1.msra.mxu1 %v297_v32  ;;  %v274_v54 = vld [vmem:[#allocation8 + $0x88] sm:$0xff]  ;;  %v279_v55 = vld [vmem:[#allocation8 + $0xb0] sm:$0xff]  ;;  %v273_v56 = vld [vmem:[#allocation8 + $0x80] sm:$0xff] }
  0x83   :  { %494 = vmatprep.subr.mxu0 %v300_v33  ;;  %419 = vmatprep.subr.mxu1 %v294_v34  ;;  %v276_v57 = vld [vmem:[#allocation8 + $0x98] sm:$0xff]  ;;  %v270_v58 = vld [vmem:[#allocation8 + $0x68] sm:$0xff]  ;;  %v275_v59 = vld [vmem:[#allocation8 + $0x90] sm:$0xff] }
  0x84   :  { %495 = vmatpush1.msra.mxu0 %v299_v35  ;;  %420 = vmatpush1.msra.mxu1 %v293_v36  ;;  %v269_v60 = vld [vmem:[#allocation8 + $0x60] sm:$0xff]  ;;  %v272_v61 = vld [vmem:[#allocation8 + $0x78] sm:$0xff]  ;;  %v266_v62 = vld [vmem:[#allocation8 + $0x48] sm:$0xff] }
  0x85   :  { %496 = vmatprep.subr.mxu0 %v296_v37  ;;  %421 = vmatprep.subr.mxu1 %v290_v38  ;;  %v271_v63 = vld [vmem:[#allocation8 + $0x70] sm:$0xff]  ;;  %v265_v0 = vld [vmem:[#allocation8 + $0x40] sm:$0xff]  ;;  %v268_v1 = vld [vmem:[#allocation8 + $0x58] sm:$0xff] }
  0x86   :  { %497 = vmatpush1.msra.mxu0 %v295_v39  ;;  %422 = vmatpush1.msra.mxu1 %v289_v40  ;;  %v262_v2 = vld [vmem:[#allocation8 + $0x28] sm:$0xff]  ;;  %v267_v3 = vld [vmem:[#allocation8 + $0x50] sm:$0xff]  ;;  %v261_v4 = vld [vmem:[#allocation8 + $0x20] sm:$0xff] }
  0x87   :  { %498 = vmatprep.subr.mxu0 %v292_v41  ;;  %423 = vmatprep.subr.mxu1 %v286_v42  ;;  %v264_v5 = vld [vmem:[#allocation8 + $0x38] sm:$0xff]  ;;  %v258_v6 = vld [vmem:[#allocation8 + $0x8] sm:$0xff]  ;;  %v263_v7 = vld [vmem:[#allocation8 + $0x30] sm:$0xff] }
  0x88   :  { %499 = vmatpush1.msra.mxu0 %v291_v43  ;;  %424 = vmatpush1.msra.mxu1 %v285_v44  ;;  %v257_v8 = vld [vmem:[#allocation8] sm:$0xff]  ;;  %v260_v9 = vld [vmem:[#allocation8 + $0x18] sm:$0xff]  ;;  %v382_v10 = vld [vmem:[#allocation8 + $0x3e8] sm:$0xff] }
  0x89   :  { %500 = vmatprep.subr.mxu0 %v288_v45  ;;  %425 = vmatprep.subr.mxu1 %v282_v46  ;;  %v259_v11 = vld [vmem:[#allocation8 + $0x10] sm:$0xff]  ;;  %v381_v12 = vld [vmem:[#allocation8 + $0x3e0] sm:$0xff]  ;;  %v384_v13 = vld [vmem:[#allocation8 + $0x3f8] sm:$0xff] }
  0x8a   :  { %501 = vmatpush1.msra.mxu0 %v287_v47  ;;  %426 = vmatpush1.msra.mxu1 %v281_v48  ;;  %v378_v14 = vld [vmem:[#allocation8 + $0x3c8] sm:$0xff]  ;;  %v383_v15 = vld [vmem:[#allocation8 + $0x3f0] sm:$0xff]  ;;  %v377_v16 = vld [vmem:[#allocation8 + $0x3c0] sm:$0xff] }
  0x8b   :  { %502 = vmatprep.subr.mxu0 %v284_v49  ;;  %427 = vmatprep.subr.mxu1 %v278_v50  ;;  %v380_v17 = vld [vmem:[#allocation8 + $0x3d8] sm:$0xff]  ;;  %v374_v18 = vld [vmem:[#allocation8 + $0x3a8] sm:$0xff]  ;;  %v379_v19 = vld [vmem:[#allocation8 + $0x3d0] sm:$0xff] }
  0x8c   :  { %503 = vmatpush1.msra.mxu0 %v283_v51  ;;  %428 = vmatpush1.msra.mxu1 %v277_v52  ;;  %v373_v20 = vld [vmem:[#allocation8 + $0x3a0] sm:$0xff]  ;;  %v376_v21 = vld [vmem:[#allocation8 + $0x3b8] sm:$0xff]  ;;  %v370_v22 = vld [vmem:[#allocation8 + $0x388] sm:$0xff] }
  0x8d   :  { %504 = vmatprep.subr.mxu0 %v280_v53  ;;  %429 = vmatprep.subr.mxu1 %v274_v54  ;;  %v375_v23 = vld [vmem:[#allocation8 + $0x3b0] sm:$0xff]  ;;  %v369_v24 = vld [vmem:[#allocation8 + $0x380] sm:$0xff]  ;;  %v372_v25 = vld [vmem:[#allocation8 + $0x398] sm:$0xff] }
  0x8e   :  { %505 = vmatpush1.msra.mxu0 %v279_v55  ;;  %430 = vmatpush1.msra.mxu1 %v273_v56  ;;  %v366_v26 = vld [vmem:[#allocation8 + $0x368] sm:$0xff]  ;;  %v371_v27 = vld [vmem:[#allocation8 + $0x390] sm:$0xff]  ;;  %v365_v28 = vld [vmem:[#allocation8 + $0x360] sm:$0xff] }
  0x8f   :  { %506 = vmatprep.subr.mxu0 %v276_v57  ;;  %431 = vmatprep.subr.mxu1 %v270_v58  ;;  %v368_v29 = vld [vmem:[#allocation8 + $0x378] sm:$0xff]  ;;  %v362_v30 = vld [vmem:[#allocation8 + $0x348] sm:$0xff]  ;;  %v367_v31 = vld [vmem:[#allocation8 + $0x370] sm:$0xff] }
  0x90   :  { %507 = vmatpush1.msra.mxu0 %v275_v59  ;;  %432 = vmatpush1.msra.mxu1 %v269_v60  ;;  %v361_v32 = vld [vmem:[#allocation8 + $0x340] sm:$0xff]  ;;  %v364_v33 = vld [vmem:[#allocation8 + $0x358] sm:$0xff]  ;;  %v358_v34 = vld [vmem:[#allocation8 + $0x328] sm:$0xff] }
  0x91   :  { %508 = vmatprep.subr.mxu0 %v272_v61  ;;  %433 = vmatprep.subr.mxu1 %v266_v62  ;;  %v363_v35 = vld [vmem:[#allocation8 + $0x350] sm:$0xff]  ;;  %v357_v36 = vld [vmem:[#allocation8 + $0x320] sm:$0xff]  ;;  %v360_v37 = vld [vmem:[#allocation8 + $0x338] sm:$0xff] }
  0x92   :  { %509 = vmatpush1.msra.mxu0 %v271_v63  ;;  %434 = vmatpush1.msra.mxu1 %v265_v0  ;;  %v354_v38 = vld [vmem:[#allocation8 + $0x308] sm:$0xff]  ;;  %v359_v39 = vld [vmem:[#allocation8 + $0x330] sm:$0xff]  ;;  %v353_v40 = vld [vmem:[#allocation8 + $0x300] sm:$0xff] }
  0x93   :  { %510 = vmatprep.subr.mxu0 %v268_v1  ;;  %435 = vmatprep.subr.mxu1 %v262_v2  ;;  %v356_v41 = vld [vmem:[#allocation8 + $0x318] sm:$0xff]  ;;  %v350_v42 = vld [vmem:[#allocation8 + $0x2e8] sm:$0xff]  ;;  %v355_v43 = vld [vmem:[#allocation8 + $0x310] sm:$0xff] }
  0x94   :  { %511 = vmatpush1.msra.mxu0 %v267_v3  ;;  %436 = vmatpush1.msra.mxu1 %v261_v4  ;;  %v349_v44 = vld [vmem:[#allocation8 + $0x2e0] sm:$0xff]  ;;  %v352_v45 = vld [vmem:[#allocation8 + $0x2f8] sm:$0xff]  ;;  %v346_v46 = vld [vmem:[#allocation8 + $0x2c8] sm:$0xff] }
  0x95   :  { %512 = vmatprep.subr.mxu0 %v264_v5  ;;  %437 = vmatprep.subr.mxu1 %v258_v6  ;;  %v351_v47 = vld [vmem:[#allocation8 + $0x2f0] sm:$0xff]  ;;  %v345_v48 = vld [vmem:[#allocation8 + $0x2c0] sm:$0xff]  ;;  %v348_v49 = vld [vmem:[#allocation8 + $0x2d8] sm:$0xff] }
  0x96   :  { %513 = vmatpush1.msra.mxu0 %v263_v7  ;;  %438 = vmatpush1.msra.mxu1 %v257_v8  ;;  %v342_v50 = vld [vmem:[#allocation8 + $0x2a8] sm:$0xff]  ;;  %v347_v51 = vld [vmem:[#allocation8 + $0x2d0] sm:$0xff]  ;;  %v341_v52 = vld [vmem:[#allocation8 + $0x2a0] sm:$0xff] }
  0x97   :  { %514 = vmatprep.subr.mxu0 %v260_v9  ;;  %439 = vmatprep.subr.mxu1 %v382_v10  ;;  %v344_v53 = vld [vmem:[#allocation8 + $0x2b8] sm:$0xff]  ;;  %v338_v54 = vld [vmem:[#allocation8 + $0x288] sm:$0xff]  ;;  %v343_v55 = vld [vmem:[#allocation8 + $0x2b0] sm:$0xff] }
  0x98   :  { %515 = vmatpush1.msra.mxu0 %v259_v11  ;;  %440 = vmatpush2.msra.mxu1 %v381_v12  ;;  %v337_v56 = vld [vmem:[#allocation8 + $0x280] sm:$0xff]  ;;  %v340_v57 = vld [vmem:[#allocation8 + $0x298] sm:$0xff]  ;;  %v339_v58 = vld [vmem:[#allocation8 + $0x290] sm:$0xff] }
  0x99   :  { %516 = vmatprep.subr.mxu0 %v384_v13  ;;  %441 = vmatprep.subr.mxu1 %v378_v14  ;;  %v334_v59 = vld [vmem:[#allocation8 + $0x268] sm:$0xff]  ;;  %v336_v60 = vld [vmem:[#allocation8 + $0x278] sm:$0xff]  ;;  %v333_v61 = vld [vmem:[#allocation8 + $0x260] sm:$0xff]  ;;  %v159_v13 = vlaneseq }
  0x9a   :  { %517 = vmatpush2.msra.mxu0 %v383_v15  ;;  %442 = vmatpush2.msra.mxu1 %v377_v16  ;;  %v335_v62 = vld [vmem:[#allocation8 + $0x270] sm:$0xff]  ;;  %v330_v63 = vld [vmem:[#allocation8 + $0x248] sm:$0xff]  ;;  %v332_v0 = vld [vmem:[#allocation8 + $0x258] sm:$0xff] }
  0x9b   :  { %518 = vmatprep.subr.mxu0 %v380_v17  ;;  %443 = vmatprep.subr.mxu1 %v374_v18  ;;  %v329_v1 = vld [vmem:[#allocation8 + $0x240] sm:$0xff]  ;;  %v331_v2 = vld [vmem:[#allocation8 + $0x250] sm:$0xff]  ;;  %v326_v3 = vld [vmem:[#allocation8 + $0x228] sm:$0xff]  ;;  %v2703_v14 = vshrl.u32 %v159_v13, 7 }
  0x9c   :  { %519 = vmatpush2.msra.mxu0 %v379_v19  ;;  %444 = vmatpush2.msra.mxu1 %v373_v20  ;;  %v328_v4 = vld [vmem:[#allocation8 + $0x238] sm:$0xff]  ;;  %v325_v5 = vld [vmem:[#allocation8 + $0x220] sm:$0xff]  ;;  %v327_v6 = vld [vmem:[#allocation8 + $0x230] sm:$0xff] }
  0x9d   :  { %520 = vmatprep.subr.mxu0 %v376_v21  ;;  %445 = vmatprep.subr.mxu1 %v370_v22  ;;  %v322_v7 = vld [vmem:[#allocation8 + $0x208] sm:$0xff]  ;;  %v324_v8 = vld [vmem:[#allocation8 + $0x218] sm:$0xff]  ;;  %v321_v9 = vld [vmem:[#allocation8 + $0x200] sm:$0xff]  ;;  %v2706_v15 = vsub.s32 0, %v2703_v14  ;;  %v2709_v17 = vsub.s32 1, %v2703_v14 }
  0x9e   :  { %521 = vmatpush2.msra.mxu0 %v375_v23  ;;  %446 = vmatpush2.msra.mxu1 %v369_v24  ;;  %v323_v10 = vld [vmem:[#allocation8 + $0x210] sm:$0xff]  ;;  %v157_v16 = vld [vmem:[#allocation7] sm:$0x3]  ;;  %v857_v13 = vld [vmem:[#allocation11 + $0x900] sm:$0xff] }
  0x9f   :  { %522 = vmatprep.subr.mxu0 %v372_v25  ;;  %447 = vmatprep.subr.mxu1 %v366_v26  ;;  %v690_v11 = vld [vmem:[#allocation11 + $0x3c8] sm:$0xff]  ;;  %v162_v18 = vrot.slane %v157_v16, %v2706_v15  ;;  %v166_v19 = vrot.slane %v157_v16, %v2709_v17 }
  0xa0   :  { %523 = vmatpush2.msra.mxu0 %v371_v27  ;;  %448 = vmatpush2.msra.mxu1 %v365_v28  ;;  %v946_v12 = vld [vmem:[#allocation11 + $0xbc8] sm:$0xff] }
  0xa1   :  { %524 = vmatprep.subr.mxu0 %v368_v29  ;;  %449 = vmatprep.subr.mxu1 %v362_v30  ;;  %v689_v29 = vld [vmem:[#allocation11 + $0x3c0] sm:$0xff]  ;;  %v594_v16 = vld [vmem:[#allocation11 + $0xc8] sm:$0xff] }
  0xa2   :  { %525 = vmatpush2.msra.mxu0 %v367_v31  ;;  %450 = vmatpush2.msra.mxu1 %v361_v32  ;;  %v945_v30 = vld [vmem:[#allocation11 + $0xbc0] sm:$0xff]  ;;  %v682_v32 = vld [vmem:[#allocation11 + $0x388] sm:$0xff] }
  0xa3   :  { %526 = vmatprep.subr.mxu0 %v364_v33  ;;  %451 = vmatprep.subr.mxu1 %v358_v34  ;;  %v938_v33 = vld [vmem:[#allocation11 + $0xb88] sm:$0xff] }
  0xa4   :  { %527 = vmatpush2.msra.mxu0 %v363_v35  ;;  %452 = vmatpush2.msra.mxu1 %v357_v36  ;;  %v681_v36 = vld [vmem:[#allocation11 + $0x380] sm:$0xff] }
  0xa5   :  { %528 = vmatprep.subr.mxu0 %v360_v37  ;;  %453 = vmatprep.subr.mxu1 %v354_v38  ;;  %v937_v37 = vld [vmem:[#allocation11 + $0xb80] sm:$0xff]  ;;  %v674_v38 = vld [vmem:[#allocation11 + $0x348] sm:$0xff] }
  0xa6   :  { %529 = vmatpush2.msra.mxu0 %v359_v39  ;;  %454 = vmatpush2.msra.mxu1 %v353_v40  ;;  %v930_v39 = vld [vmem:[#allocation11 + $0xb48] sm:$0xff]  ;;  %v673_v40 = vld [vmem:[#allocation11 + $0x340] sm:$0xff] }
  0xa7   :  { %530 = vmatprep.subr.mxu0 %v356_v41  ;;  %455 = vmatprep.subr.mxu1 %v350_v42  ;;  %v929_v41 = vld [vmem:[#allocation11 + $0xb40] sm:$0xff]  ;;  %v666_v42 = vld [vmem:[#allocation11 + $0x308] sm:$0xff] }
  0xa8   :  { %531 = vmatpush2.msra.mxu0 %v355_v43  ;;  %456 = vmatpush2.msra.mxu1 %v349_v44  ;;  %v922_v43 = vld [vmem:[#allocation11 + $0xb08] sm:$0xff]  ;;  %v665_v44 = vld [vmem:[#allocation11 + $0x300] sm:$0xff] }
  0xa9   :  { %532 = vmatprep.subr.mxu0 %v352_v45  ;;  %457 = vmatprep.subr.mxu1 %v346_v46  ;;  %v921_v45 = vld [vmem:[#allocation11 + $0xb00] sm:$0xff]  ;;  %v658_v46 = vld [vmem:[#allocation11 + $0x2c8] sm:$0xff] }
  0xaa   :  { %533 = vmatpush2.msra.mxu0 %v351_v47  ;;  %458 = vmatpush2.msra.mxu1 %v345_v48  ;;  %v914_v47 = vld [vmem:[#allocation11 + $0xac8] sm:$0xff]  ;;  %v657_v48 = vld [vmem:[#allocation11 + $0x2c0] sm:$0xff] }
  0xab   :  { %534 = vmatprep.subr.mxu0 %v348_v49  ;;  %459 = vmatprep.subr.mxu1 %v342_v50  ;;  %v913_v49 = vld [vmem:[#allocation11 + $0xac0] sm:$0xff]  ;;  %v650_v50 = vld [vmem:[#allocation11 + $0x288] sm:$0xff] }
  0xac   :  { %535 = vmatpush2.msra.mxu0 %v347_v51  ;;  %460 = vmatpush2.msra.mxu1 %v341_v52  ;;  %v906_v51 = vld [vmem:[#allocation11 + $0xa88] sm:$0xff]  ;;  %v649_v52 = vld [vmem:[#allocation11 + $0x280] sm:$0xff] }
  0xad   :  { %536 = vmatprep.subr.mxu0 %v344_v53  ;;  %461 = vmatprep.subr.mxu1 %v338_v54  ;;  %v905_v53 = vld [vmem:[#allocation11 + $0xa80] sm:$0xff]  ;;  %v642_v54 = vld [vmem:[#allocation11 + $0x248] sm:$0xff] }
  0xae   :  { %537 = vmatpush2.msra.mxu0 %v343_v55  ;;  %462 = vmatpush2.msra.mxu1 %v337_v56  ;;  %v898_v55 = vld [vmem:[#allocation11 + $0xa48] sm:$0xff]  ;;  %v641_v56 = vld [vmem:[#allocation11 + $0x240] sm:$0xff] }
  0xaf   :  { %538 = vmatprep.subr.mxu0 %v340_v57  ;;  %463 = vmatprep.subr.mxu1 %v334_v59  ;;  %v897_v57 = vld [vmem:[#allocation11 + $0xa40] sm:$0xff]  ;;  %v890_v59 = vld [vmem:[#allocation11 + $0xa08] sm:$0xff] }
  0xb0   :  { %539 = vmatpush2.msra.mxu0 %v339_v58  ;;  %464 = vmatpush2.msra.mxu1 %v333_v61  ;;  %v634_v58 = vld [vmem:[#allocation11 + $0x208] sm:$0xff]  ;;  %v889_v61 = vld [vmem:[#allocation11 + $0xa00] sm:$0xff] }
  0xb1   :  { %540 = vmatprep.subr.mxu0 %v336_v60  ;;  %465 = vmatprep.subr.mxu1 %v330_v63  ;;  %v633_v60 = vld [vmem:[#allocation11 + $0x200] sm:$0xff]  ;;  %v882_v63 = vld [vmem:[#allocation11 + $0x9c8] sm:$0xff] }
  0xb2   :  { %541 = vmatpush2.msra.mxu0 %v335_v62  ;;  %466 = vmatpush2.msra.mxu1 %v329_v1  ;;  %v626_v62 = vld [vmem:[#allocation11 + $0x1c8] sm:$0xff]  ;;  %v881_v1 = vld [vmem:[#allocation11 + $0x9c0] sm:$0xff] }
  0xb3   :  { %542 = vmatprep.subr.mxu0 %v332_v0  ;;  %467 = vmatprep.subr.mxu1 %v326_v3  ;;  %v625_v0 = vld [vmem:[#allocation11 + $0x1c0] sm:$0xff]  ;;  %v874_v3 = vld [vmem:[#allocation11 + $0x988] sm:$0xff] }
  0xb4   :  { %543 = vmatpush2.msra.mxu0 %v331_v2  ;;  %468 = vmatpush2.msra.mxu1 %v325_v5  ;;  %v618_v2 = vld [vmem:[#allocation11 + $0x188] sm:$0xff]  ;;  %v873_v5 = vld [vmem:[#allocation11 + $0x980] sm:$0xff] }
  0xb5   :  { %544 = vmatprep.subr.mxu0 %v328_v4  ;;  %469 = vmatprep.subr.mxu1 %v322_v7  ;;  %v617_v4 = vld [vmem:[#allocation11 + $0x180] sm:$0xff]  ;;  %v866_v7 = vld [vmem:[#allocation11 + $0x948] sm:$0xff] }
  0xb6   :  { %545 = vmatpush2.msra.mxu0 %v327_v6  ;;  %470 = vmatpush2.msra.mxu1 %v321_v9  ;;  %v610_v6 = vld [vmem:[#allocation11 + $0x148] sm:$0xff]  ;;  %v865_v9 = vld [vmem:[#allocation11 + $0x940] sm:$0xff] }
  0xb7   :  { %546 = vmatprep.subr.mxu0 %v324_v8  ;;  %1123 = vmatprep.subr.mxu1 %v690_v11  ;;  %v609_v8 = vld [vmem:[#allocation11 + $0x140] sm:$0xff]  ;;  %v858_v11 = vld [vmem:[#allocation11 + $0x908] sm:$0xff] }
  0xb8   :  { %547 = vmatpush2.msra.mxu0 %v323_v10  ;;  %v602_v10 = vld [vmem:[#allocation11 + $0x108] sm:$0xff] }
  0xb9   :  { %1200 = vmatprep.subr.mxu0 %v946_v12  ;;  %v601_v12 = vld [vmem:[#allocation11 + $0x100] sm:$0xff] }
 0x139   :  { %v242_v20 = vpop.f32.mrf.mxu0 }
 0x13a   :  { %v243_v21 = vadd.f32 %v242_v20, %v162_v18  ;;  %v849_v20 = vld [vmem:[#allocation11 + $0x8c0] sm:$0xff] }
 0x13b   :  { %v244_v22 = vpop.f32.mrf.mxu0 }
 0x13c   :  { %v245_v23 = vadd.f32 %v244_v22, %v166_v19  ;;  %v253_v27 = vmax.f32 %v243_v21, 0.0  ;;  %v586_v21 = vld [vmem:[#allocation11 + $0x88] sm:$0xff] }
 0x13d   :  { %v248_v24 = vpop.f32.mrf.mxu0  ;;  %v842_v22 = vld [vmem:[#allocation11 + $0x888] sm:$0xff] }
 0x13e   :  { %v254_v25 = vmax.f32 %v245_v23, 0.0  ;;  %v249_v26 = vadd.f32 %v248_v24, %v162_v18  ;;  %v850_v18 = vld [vmem:[#allocation11 + $0x8c8] sm:$0xff]  ;;  %v585_v23 = vld [vmem:[#allocation11 + $0x80] sm:$0xff] }
 0x13f   :  { %v250_v28 = vpop.f32.mrf.mxu0  ;;  %v841_v24 = vld [vmem:[#allocation11 + $0x880] sm:$0xff] }
 0x140   :  { %v251_v31 = vadd.f32 %v250_v28, %v166_v19  ;;  %471 = vmatprep.mubr.f32.mxu1 %v254_v25  ;;  %548 = vmatprep.mubr.f32.mxu0 %v254_v25  ;;  %v255_v34 = vmax.f32 %v249_v26, 0.0  ;;  %v593_v19 = vld [vmem:[#allocation11 + $0xc0] sm:$0xff]  ;;  %v578_v25 = vld [vmem:[#allocation11 + $0x48] sm:$0xff] }
 0x141   :  { %472 = vmatmul.mubr.f32.vlgmr.msra.gmra.mxu1 %v253_v27  ;;  %549 = vmatmul.mubr.f32.vlgmr.msra.gmra.mxu0 %v253_v27  ;;  %v834_v26 = vld [vmem:[#allocation11 + $0x848] sm:$0xff]  ;;  %v577_v27 = vld [vmem:[#allocation11 + $0x40] sm:$0xff] }
 0x142   :  { %v256_v35 = vmax.f32 %v251_v31, 0.0  ;;  %1124 = vmatpush1.msra.mxu1 %v689_v29  ;;  %1201 = vmatpush1.msra.mxu0 %v945_v30  ;;  %v833_v28 = vld [vmem:[#allocation11 + $0x840] sm:$0xff]  ;;  %v570_v29 = vld [vmem:[#allocation11 + $0x8] sm:$0xff] }
 0x143   :  { %1125 = vmatprep.subr.mxu1 %v682_v32  ;;  %1202 = vmatprep.subr.mxu0 %v938_v33  ;;  %v826_v30 = vld [vmem:[#allocation11 + $0x808] sm:$0xff]  ;;  %v569_v31 = vld [vmem:[#allocation11] sm:$0xff] }
 0x144   :  { %477 = vmatprep.mubr.f32.mxu1 %v256_v35  ;;  %554 = vmatprep.mubr.f32.mxu0 %v256_v35  ;;  %v825_v32 = vld [vmem:[#allocation11 + $0x800] sm:$0xff]  ;;  %v818_v33 = vld [vmem:[#allocation11 + $0x7c8] sm:$0xff] }
 0x145   :  { %478 = vmatmul.mubr.f32.gmra.mxu1 %v255_v34  ;;  %555 = vmatmul.mubr.f32.gmra.mxu0 %v255_v34  ;;  %v1074_v34 = vld [vmem:[#allocation11 + $0xfc8] sm:$0xff]  ;;  %v817_v35 = vld [vmem:[#allocation11 + $0x7c0] sm:$0xff] }
 0x146   :  { %1126 = vmatpush1.msra.mxu1 %v681_v36  ;;  %1203 = vmatpush1.msra.mxu0 %v937_v37  ;;  %v1073_v36 = vld [vmem:[#allocation11 + $0xfc0] sm:$0xff]  ;;  %v810_v37 = vld [vmem:[#allocation11 + $0x788] sm:$0xff] }
 0x147   :  { %1127 = vmatprep.subr.mxu1 %v674_v38  ;;  %1204 = vmatprep.subr.mxu0 %v930_v39  ;;  %v1066_v38 = vld [vmem:[#allocation11 + $0xf88] sm:$0xff]  ;;  %v809_v39 = vld [vmem:[#allocation11 + $0x780] sm:$0xff] }
 0x148   :  { %1128 = vmatpush1.msra.mxu1 %v673_v40  ;;  %1205 = vmatpush1.msra.mxu0 %v929_v41  ;;  %v1065_v40 = vld [vmem:[#allocation11 + $0xf80] sm:$0xff]  ;;  %v802_v41 = vld [vmem:[#allocation11 + $0x748] sm:$0xff] }
 0x149   :  { %1129 = vmatprep.subr.mxu1 %v666_v42  ;;  %1206 = vmatprep.subr.mxu0 %v922_v43  ;;  %v1058_v42 = vld [vmem:[#allocation11 + $0xf48] sm:$0xff]  ;;  %v801_v43 = vld [vmem:[#allocation11 + $0x740] sm:$0xff] }
 0x14a   :  { %1130 = vmatpush1.msra.mxu1 %v665_v44  ;;  %1207 = vmatpush1.msra.mxu0 %v921_v45  ;;  %v1057_v44 = vld [vmem:[#allocation11 + $0xf40] sm:$0xff]  ;;  %v794_v45 = vld [vmem:[#allocation11 + $0x708] sm:$0xff] }
 0x14b   :  { %1131 = vmatprep.subr.mxu1 %v658_v46  ;;  %1208 = vmatprep.subr.mxu0 %v914_v47  ;;  %v1050_v46 = vld [vmem:[#allocation11 + $0xf08] sm:$0xff]  ;;  %v793_v47 = vld [vmem:[#allocation11 + $0x700] sm:$0xff] }
 0x14c   :  { %1132 = vmatpush1.msra.mxu1 %v657_v48  ;;  %1209 = vmatpush1.msra.mxu0 %v913_v49  ;;  %v1049_v48 = vld [vmem:[#allocation11 + $0xf00] sm:$0xff]  ;;  %v786_v49 = vld [vmem:[#allocation11 + $0x6c8] sm:$0xff] }
 0x14d   :  { %1133 = vmatprep.subr.mxu1 %v650_v50  ;;  %1210 = vmatprep.subr.mxu0 %v906_v51  ;;  %v1042_v50 = vld [vmem:[#allocation11 + $0xec8] sm:$0xff]  ;;  %v785_v51 = vld [vmem:[#allocation11 + $0x6c0] sm:$0xff] }
 0x14e   :  { %1134 = vmatpush1.msra.mxu1 %v649_v52  ;;  %1211 = vmatpush1.msra.mxu0 %v905_v53  ;;  %v1041_v52 = vld [vmem:[#allocation11 + $0xec0] sm:$0xff]  ;;  %v778_v53 = vld [vmem:[#allocation11 + $0x688] sm:$0xff] }
 0x14f   :  { %1135 = vmatprep.subr.mxu1 %v642_v54  ;;  %1212 = vmatprep.subr.mxu0 %v898_v55  ;;  %v1034_v54 = vld [vmem:[#allocation11 + $0xe88] sm:$0xff]  ;;  %v777_v55 = vld [vmem:[#allocation11 + $0x680] sm:$0xff] }
 0x150   :  { %1136 = vmatpush1.msra.mxu1 %v641_v56  ;;  %1213 = vmatpush1.msra.mxu0 %v897_v57  ;;  %v1033_v56 = vld [vmem:[#allocation11 + $0xe80] sm:$0xff]  ;;  %v770_v57 = vld [vmem:[#allocation11 + $0x648] sm:$0xff] }
 0x151   :  { %1137 = vmatprep.subr.mxu1 %v634_v58  ;;  %1214 = vmatprep.subr.mxu0 %v890_v59  ;;  %v1026_v58 = vld [vmem:[#allocation11 + $0xe48] sm:$0xff]  ;;  %v769_v59 = vld [vmem:[#allocation11 + $0x640] sm:$0xff] }
 0x152   :  { %1138 = vmatpush1.msra.mxu1 %v633_v60  ;;  %1215 = vmatpush1.msra.mxu0 %v889_v61  ;;  %v1025_v60 = vld [vmem:[#allocation11 + $0xe40] sm:$0xff]  ;;  %v762_v61 = vld [vmem:[#allocation11 + $0x608] sm:$0xff] }
 0x153   :  { %1139 = vmatprep.subr.mxu1 %v626_v62  ;;  %1216 = vmatprep.subr.mxu0 %v882_v63  ;;  %v1018_v62 = vld [vmem:[#allocation11 + $0xe08] sm:$0xff]  ;;  %v761_v63 = vld [vmem:[#allocation11 + $0x600] sm:$0xff] }
 0x154   :  { %1140 = vmatpush1.msra.mxu1 %v625_v0  ;;  %1217 = vmatpush1.msra.mxu0 %v881_v1  ;;  %v1017_v0 = vld [vmem:[#allocation11 + $0xe00] sm:$0xff]  ;;  %v754_v1 = vld [vmem:[#allocation11 + $0x5c8] sm:$0xff] }
 0x155   :  { %1141 = vmatprep.subr.mxu1 %v618_v2  ;;  %1218 = vmatprep.subr.mxu0 %v874_v3  ;;  %v1010_v2 = vld [vmem:[#allocation11 + $0xdc8] sm:$0xff]  ;;  %v753_v3 = vld [vmem:[#allocation11 + $0x5c0] sm:$0xff] }
 0x156   :  { %1142 = vmatpush1.msra.mxu1 %v617_v4  ;;  %1219 = vmatpush1.msra.mxu0 %v873_v5  ;;  %v1009_v4 = vld [vmem:[#allocation11 + $0xdc0] sm:$0xff]  ;;  %v746_v5 = vld [vmem:[#allocation11 + $0x588] sm:$0xff] }
 0x157   :  { %1143 = vmatprep.subr.mxu1 %v610_v6  ;;  %1220 = vmatprep.subr.mxu0 %v866_v7  ;;  %v1002_v6 = vld [vmem:[#allocation11 + $0xd88] sm:$0xff]  ;;  %v745_v7 = vld [vmem:[#allocation11 + $0x580] sm:$0xff] }
 0x158   :  { %1144 = vmatpush1.msra.mxu1 %v609_v8  ;;  %1221 = vmatpush1.msra.mxu0 %v865_v9  ;;  %v1001_v8 = vld [vmem:[#allocation11 + $0xd80] sm:$0xff]  ;;  %v738_v9 = vld [vmem:[#allocation11 + $0x548] sm:$0xff] }
 0x159   :  { %1145 = vmatprep.subr.mxu1 %v602_v10  ;;  %1222 = vmatprep.subr.mxu0 %v858_v11  ;;  %v994_v10 = vld [vmem:[#allocation11 + $0xd48] sm:$0xff]  ;;  %v737_v11 = vld [vmem:[#allocation11 + $0x540] sm:$0xff] }
 0x15a   :  { %1146 = vmatpush1.msra.mxu1 %v601_v12  ;;  %1223 = vmatpush1.msra.mxu0 %v857_v13  ;;  %v993_v12 = vld [vmem:[#allocation11 + $0xd40] sm:$0xff]  ;;  %v730_v13 = vld [vmem:[#allocation11 + $0x508] sm:$0xff] }
 0x15b   :  { %1147 = vmatprep.subr.mxu1 %v594_v16  ;;  %1224 = vmatprep.subr.mxu0 %v850_v18  ;;  %v986_v16 = vld [vmem:[#allocation11 + $0xd08] sm:$0xff]  ;;  %v729_v18 = vld [vmem:[#allocation11 + $0x500] sm:$0xff] }
 0x15c   :  { %1148 = vmatpush1.msra.mxu1 %v593_v19  ;;  %1225 = vmatpush1.msra.mxu0 %v849_v20  ;;  %v985_v19 = vld [vmem:[#allocation11 + $0xd00] sm:$0xff]  ;;  %v722_v20 = vld [vmem:[#allocation11 + $0x4c8] sm:$0xff] }
 0x15d   :  { %1149 = vmatprep.subr.mxu1 %v586_v21  ;;  %1226 = vmatprep.subr.mxu0 %v842_v22  ;;  %v978_v21 = vld [vmem:[#allocation11 + $0xcc8] sm:$0xff]  ;;  %v721_v22 = vld [vmem:[#allocation11 + $0x4c0] sm:$0xff] }
 0x15e   :  { %1150 = vmatpush1.msra.mxu1 %v585_v23  ;;  %1227 = vmatpush1.msra.mxu0 %v841_v24  ;;  %v977_v23 = vld [vmem:[#allocation11 + $0xcc0] sm:$0xff]  ;;  %v714_v24 = vld [vmem:[#allocation11 + $0x488] sm:$0xff] }
 0x15f   :  { %1151 = vmatprep.subr.mxu1 %v578_v25  ;;  %1228 = vmatprep.subr.mxu0 %v834_v26  ;;  %v970_v25 = vld [vmem:[#allocation11 + $0xc88] sm:$0xff]  ;;  %v713_v26 = vld [vmem:[#allocation11 + $0x480] sm:$0xff] }
 0x160   :  { %1152 = vmatpush1.msra.mxu1 %v577_v27  ;;  %1229 = vmatpush1.msra.mxu0 %v833_v28  ;;  %v969_v27 = vld [vmem:[#allocation11 + $0xc80] sm:$0xff]  ;;  %v706_v28 = vld [vmem:[#allocation11 + $0x448] sm:$0xff] }
 0x161   :  { %1153 = vmatprep.subr.mxu1 %v570_v29  ;;  %1230 = vmatprep.subr.mxu0 %v826_v30  ;;  %v962_v29 = vld [vmem:[#allocation11 + $0xc48] sm:$0xff]  ;;  %v705_v30 = vld [vmem:[#allocation11 + $0x440] sm:$0xff] }
 0x162   :  { %1154 = vmatpush1.msra.mxu1 %v569_v31  ;;  %1231 = vmatpush1.msra.mxu0 %v825_v32  ;;  %v961_v31 = vld [vmem:[#allocation11 + $0xc40] sm:$0xff]  ;;  %v698_v32 = vld [vmem:[#allocation11 + $0x408] sm:$0xff] }
 0x163   :  { %1155 = vmatprep.subr.mxu1 %v818_v33  ;;  %1232 = vmatprep.subr.mxu0 %v1074_v34  ;;  %v954_v33 = vld [vmem:[#allocation11 + $0xc08] sm:$0xff]  ;;  %v697_v34 = vld [vmem:[#allocation11 + $0x400] sm:$0xff] }
 0x164   :  { %1156 = vmatpush2.msra.mxu1 %v817_v35  ;;  %1233 = vmatpush2.msra.mxu0 %v1073_v36  ;;  %v953_v35 = vld [vmem:[#allocation11 + $0xc00] sm:$0xff]  ;;  %v692_v36 = vld [vmem:[#allocation11 + $0x3d8] sm:$0xff] }
 0x165   :  { %1157 = vmatprep.subr.mxu1 %v810_v37  ;;  %1234 = vmatprep.subr.mxu0 %v1066_v38  ;;  %v948_v37 = vld [vmem:[#allocation11 + $0xbd8] sm:$0xff]  ;;  %v397_v38 = vsub.s32 2, %v2703_v14 }
 0x166   :  { %1158 = vmatpush2.msra.mxu1 %v809_v39  ;;  %1235 = vmatpush2.msra.mxu0 %v1065_v40  ;;  %v385_v39 = vld [vmem:[#allocation10] sm:$0xf]  ;;  %v401_v40 = vsub.s32 3, %v2703_v14 }
 0x167   :  { %1159 = vmatprep.subr.mxu1 %v802_v41  ;;  %1236 = vmatprep.subr.mxu0 %v1058_v42  ;;  %v390_v41 = vrot.slane %v385_v39, %v2706_v15  ;;  %v398_v42 = vrot.slane %v385_v39, %v397_v38 }
 0x168   :  { %1160 = vmatpush2.msra.mxu1 %v801_v43  ;;  %1237 = vmatpush2.msra.mxu0 %v1057_v44  ;;  %v394_v43 = vrot.slane %v385_v39, %v2709_v17  ;;  %v402_v44 = vrot.slane %v385_v39, %v401_v40  ;;  %v628_v39 = vld [vmem:[#allocation11 + $0x1d8] sm:$0xff] }
 0x169   :  { %1161 = vmatprep.subr.mxu1 %v794_v45  ;;  %1238 = vmatprep.subr.mxu0 %v1050_v46 }
 0x16a   :  { %1162 = vmatpush2.msra.mxu1 %v793_v47  ;;  %1239 = vmatpush2.msra.mxu0 %v1049_v48 }
 0x16b   :  { %1163 = vmatprep.subr.mxu1 %v786_v49  ;;  %1240 = vmatprep.subr.mxu0 %v1042_v50 }
 0x16c   :  { %1164 = vmatpush2.msra.mxu1 %v785_v51  ;;  %1241 = vmatpush2.msra.mxu0 %v1041_v52 }
 0x16d   :  { %1165 = vmatprep.subr.mxu1 %v778_v53  ;;  %1242 = vmatprep.subr.mxu0 %v1034_v54 }
 0x16e   :  { %1166 = vmatpush2.msra.mxu1 %v777_v55  ;;  %1243 = vmatpush2.msra.mxu0 %v1033_v56 }
 0x16f   :  { %1167 = vmatprep.subr.mxu1 %v770_v57  ;;  %1244 = vmatprep.subr.mxu0 %v1026_v58 }
 0x170   :  { %1168 = vmatpush2.msra.mxu1 %v769_v59  ;;  %1245 = vmatpush2.msra.mxu0 %v1025_v60 }
 0x171   :  { %1169 = vmatprep.subr.mxu1 %v762_v61  ;;  %1246 = vmatprep.subr.mxu0 %v1018_v62 }
 0x172   :  { %1170 = vmatpush2.msra.mxu1 %v761_v63  ;;  %1247 = vmatpush2.msra.mxu0 %v1017_v0  ;;  %v691_v63 = vld [vmem:[#allocation11 + $0x3d0] sm:$0xff] }
 0x173   :  { %1171 = vmatprep.subr.mxu1 %v754_v1  ;;  %1248 = vmatprep.subr.mxu0 %v1010_v2  ;;  %v947_v0 = vld [vmem:[#allocation11 + $0xbd0] sm:$0xff] }
 0x174   :  { %1172 = vmatpush2.msra.mxu1 %v753_v3  ;;  %1249 = vmatpush2.msra.mxu0 %v1009_v4  ;;  %v684_v3 = vld [vmem:[#allocation11 + $0x398] sm:$0xff] }
 0x175   :  { %1173 = vmatprep.subr.mxu1 %v746_v5  ;;  %1250 = vmatprep.subr.mxu0 %v1002_v6  ;;  %v940_v4 = vld [vmem:[#allocation11 + $0xb98] sm:$0xff]  ;;  %v683_v5 = vld [vmem:[#allocation11 + $0x390] sm:$0xff] }
 0x176   :  { %1174 = vmatpush2.msra.mxu1 %v745_v7  ;;  %1251 = vmatpush2.msra.mxu0 %v1001_v8  ;;  %v939_v6 = vld [vmem:[#allocation11 + $0xb90] sm:$0xff] }
 0x177   :  { %1175 = vmatprep.subr.mxu1 %v738_v9  ;;  %1252 = vmatprep.subr.mxu0 %v994_v10 }
 0x178   :  { %1176 = vmatpush2.msra.mxu1 %v737_v11  ;;  %1253 = vmatpush2.msra.mxu0 %v993_v12  ;;  %v676_v11 = vld [vmem:[#allocation11 + $0x358] sm:$0xff] }
 0x179   :  { %1177 = vmatprep.subr.mxu1 %v730_v13  ;;  %1254 = vmatprep.subr.mxu0 %v986_v16  ;;  %v932_v12 = vld [vmem:[#allocation11 + $0xb58] sm:$0xff]  ;;  %v675_v13 = vld [vmem:[#allocation11 + $0x350] sm:$0xff] }
 0x17a   :  { %1178 = vmatpush2.msra.mxu1 %v729_v18  ;;  %1255 = vmatpush2.msra.mxu0 %v985_v19  ;;  %v931_v16 = vld [vmem:[#allocation11 + $0xb50] sm:$0xff]  ;;  %v668_v18 = vld [vmem:[#allocation11 + $0x318] sm:$0xff] }
 0x17b   :  { %1179 = vmatprep.subr.mxu1 %v722_v20  ;;  %1256 = vmatprep.subr.mxu0 %v978_v21  ;;  %v924_v19 = vld [vmem:[#allocation11 + $0xb18] sm:$0xff]  ;;  %v667_v20 = vld [vmem:[#allocation11 + $0x310] sm:$0xff] }
 0x17c   :  { %1180 = vmatpush2.msra.mxu1 %v721_v22  ;;  %1257 = vmatpush2.msra.mxu0 %v977_v23  ;;  %v923_v21 = vld [vmem:[#allocation11 + $0xb10] sm:$0xff]  ;;  %v660_v22 = vld [vmem:[#allocation11 + $0x2d8] sm:$0xff] }
 0x17d   :  { %1181 = vmatprep.subr.mxu1 %v714_v24  ;;  %1258 = vmatprep.subr.mxu0 %v970_v25  ;;  %v916_v23 = vld [vmem:[#allocation11 + $0xad8] sm:$0xff]  ;;  %v659_v24 = vld [vmem:[#allocation11 + $0x2d0] sm:$0xff] }
 0x17e   :  { %1182 = vmatpush2.msra.mxu1 %v713_v26  ;;  %1259 = vmatpush2.msra.mxu0 %v969_v27  ;;  %v915_v25 = vld [vmem:[#allocation11 + $0xad0] sm:$0xff]  ;;  %v652_v26 = vld [vmem:[#allocation11 + $0x298] sm:$0xff] }
 0x17f   :  { %1183 = vmatprep.subr.mxu1 %v706_v28  ;;  %1260 = vmatprep.subr.mxu0 %v962_v29  ;;  %v908_v27 = vld [vmem:[#allocation11 + $0xa98] sm:$0xff]  ;;  %v651_v28 = vld [vmem:[#allocation11 + $0x290] sm:$0xff] }
 0x180   :  { %1184 = vmatpush2.msra.mxu1 %v705_v30  ;;  %1261 = vmatpush2.msra.mxu0 %v961_v31  ;;  %v907_v29 = vld [vmem:[#allocation11 + $0xa90] sm:$0xff]  ;;  %v644_v30 = vld [vmem:[#allocation11 + $0x258] sm:$0xff] }
 0x181   :  { %1185 = vmatprep.subr.mxu1 %v698_v32  ;;  %1262 = vmatprep.subr.mxu0 %v954_v33  ;;  %v900_v31 = vld [vmem:[#allocation11 + $0xa58] sm:$0xff]  ;;  %v643_v32 = vld [vmem:[#allocation11 + $0x250] sm:$0xff] }
 0x182   :  { %1186 = vmatpush2.msra.mxu1 %v697_v34  ;;  %1263 = vmatpush2.msra.mxu0 %v953_v35  ;;  %v899_v33 = vld [vmem:[#allocation11 + $0xa50] sm:$0xff]  ;;  %v636_v34 = vld [vmem:[#allocation11 + $0x218] sm:$0xff] }
 0x183   :  { %1277 = vmatprep.subr.mxu1 %v692_v36  ;;  %1354 = vmatprep.subr.mxu0 %v948_v37  ;;  %v892_v35 = vld [vmem:[#allocation11 + $0xa18] sm:$0xff]  ;;  %v635_v36 = vld [vmem:[#allocation11 + $0x210] sm:$0xff] }
 0x184   :  { %v891_v37 = vld [vmem:[#allocation11 + $0xa10] sm:$0xff] }
 0x201   :  { %v473_v45 = vpop.f32.mrf.mxu1  ;;  %v550_v46 = vpop.f32.mrf.mxu0 }
 0x202   :  { %v474_v47 = vadd.f32 %v473_v45, %v390_v41  ;;  %v551_v48 = vadd.f32 %v550_v46, %v398_v42  ;;  %v876_v45 = vld [vmem:[#allocation11 + $0x998] sm:$0xff]  ;;  %v619_v46 = vld [vmem:[#allocation11 + $0x190] sm:$0xff] }
 0x203   :  { %v475_v49 = vpop.f32.mrf.mxu1  ;;  %v552_v50 = vpop.f32.mrf.mxu0 }
 0x204   :  { %v476_v51 = vadd.f32 %v475_v49, %v394_v43  ;;  %v553_v52 = vadd.f32 %v552_v50, %v402_v44  ;;  %v2725_v57 = vmax.f32 %v474_v47, 0.0  ;;  %v2727_v58 = vmax.f32 %v551_v48, 0.0  ;;  %v875_v47 = vld [vmem:[#allocation11 + $0x990] sm:$0xff]  ;;  %v612_v48 = vld [vmem:[#allocation11 + $0x158] sm:$0xff] }
 0x205   :  { %v479_v53 = vpop.f32.mrf.mxu1  ;;  %v556_v54 = vpop.f32.mrf.mxu0  ;;  %v868_v49 = vld [vmem:[#allocation11 + $0x958] sm:$0xff]  ;;  %v611_v50 = vld [vmem:[#allocation11 + $0x150] sm:$0xff] }
 0x206   :  { %v2721_v55 = vmax.f32 %v476_v51, 0.0  ;;  %v2723_v56 = vmax.f32 %v553_v52, 0.0  ;;  %v480_v59 = vadd.f32 %v479_v53, %v390_v41  ;;  %v557_v60 = vadd.f32 %v556_v54, %v398_v42  ;;  %v884_v41 = vld [vmem:[#allocation11 + $0x9d8] sm:$0xff]  ;;  %v627_v42 = vld [vmem:[#allocation11 + $0x1d0] sm:$0xff] }
 0x207   :  { %v481_v61 = vpop.f32.mrf.mxu1  ;;  %v558_v62 = vpop.f32.mrf.mxu0  ;;  %v867_v51 = vld [vmem:[#allocation11 + $0x950] sm:$0xff]  ;;  %v604_v52 = vld [vmem:[#allocation11 + $0x118] sm:$0xff] }
 0x208   :  { %v482_v1 = vadd.f32 %v481_v61, %v394_v43  ;;  %v559_v2 = vadd.f32 %v558_v62, %v402_v44  ;;  %1187 = vmatprep.mubr.f32.mxu1 %v2721_v55  ;;  %1264 = vmatprep.mubr.f32.mxu0 %v2723_v56  ;;  %v2737_v9 = vmax.f32 %v480_v59, 0.0  ;;  %v2739_v10 = vmax.f32 %v557_v60, 0.0  ;;  %v883_v43 = vld [vmem:[#allocation11 + $0x9d0] sm:$0xff]  ;;  %v620_v44 = vld [vmem:[#allocation11 + $0x198] sm:$0xff] }
 0x209   :  { %1188 = vmatmul.mubr.f32.vlgmr.msra.gmra.mxu1 %v2725_v57  ;;  %1265 = vmatmul.mubr.f32.vlgmr.msra.gmra.mxu0 %v2727_v58  ;;  %v860_v53 = vld [vmem:[#allocation11 + $0x918] sm:$0xff]  ;;  %v603_v54 = vld [vmem:[#allocation11 + $0x110] sm:$0xff] }
 0x20a   :  { %v2733_v7 = vmax.f32 %v482_v1, 0.0  ;;  %v2735_v8 = vmax.f32 %v559_v2, 0.0  ;;  %1278 = vmatpush1.msra.mxu1 %v691_v63  ;;  %1355 = vmatpush1.msra.mxu0 %v947_v0  ;;  %v859_v59 = vld [vmem:[#allocation11 + $0x910] sm:$0xff]  ;;  %v596_v60 = vld [vmem:[#allocation11 + $0xd8] sm:$0xff] }
 0x20b   :  { %1279 = vmatprep.subr.mxu1 %v684_v3  ;;  %1356 = vmatprep.subr.mxu0 %v940_v4  ;;  %v852_v61 = vld [vmem:[#allocation11 + $0x8d8] sm:$0xff]  ;;  %v595_v62 = vld [vmem:[#allocation11 + $0xd0] sm:$0xff] }
 0x20c   :  { %1280 = vmatpush1.msra.mxu1 %v683_v5  ;;  %1357 = vmatpush1.msra.mxu0 %v939_v6  ;;  %v851_v63 = vld [vmem:[#allocation11 + $0x8d0] sm:$0xff]  ;;  %v588_v0 = vld [vmem:[#allocation11 + $0x98] sm:$0xff] }
 0x20d   :  { %1193 = vmatprep.mubr.f32.mxu1 %v2733_v7  ;;  %1270 = vmatprep.mubr.f32.mxu0 %v2735_v8  ;;  %v844_v1 = vld [vmem:[#allocation11 + $0x898] sm:$0xff]  ;;  %v587_v2 = vld [vmem:[#allocation11 + $0x90] sm:$0xff] }
 0x20e   :  { %1281 = vmatprep.subr.mxu1 %v676_v11  ;;  %1358 = vmatprep.subr.mxu0 %v932_v12  ;;  %v843_v3 = vld [vmem:[#allocation11 + $0x890] sm:$0xff]  ;;  %v580_v4 = vld [vmem:[#allocation11 + $0x58] sm:$0xff] }
 0x20f   :  { %1194 = vmatmul.mubr.f32.gmra.mxu1 %v2737_v9  ;;  %1271 = vmatmul.mubr.f32.gmra.mxu0 %v2739_v10  ;;  %v836_v5 = vld [vmem:[#allocation11 + $0x858] sm:$0xff]  ;;  %v579_v6 = vld [vmem:[#allocation11 + $0x50] sm:$0xff] }
 0x210   :  { %1282 = vmatpush1.msra.mxu1 %v675_v13  ;;  %1359 = vmatpush1.msra.mxu0 %v931_v16  ;;  %v835_v11 = vld [vmem:[#allocation11 + $0x850] sm:$0xff]  ;;  %v572_v12 = vld [vmem:[#allocation11 + $0x18] sm:$0xff] }
 0x211   :  { %1283 = vmatprep.subr.mxu1 %v668_v18  ;;  %1341 = vmatprep.mubr.f32.mxu1 %v2721_v55  ;;  %v828_v13 = vld [vmem:[#allocation11 + $0x818] sm:$0xff]  ;;  %v571_v16 = vld [vmem:[#allocation11 + $0x10] sm:$0xff] }
 0x212   :  { %1360 = vmatprep.subr.mxu0 %v924_v19  ;;  %1418 = vmatprep.mubr.f32.mxu0 %v2723_v56  ;;  %v827_v18 = vld [vmem:[#allocation11 + $0x810] sm:$0xff]  ;;  %v820_v19 = vld [vmem:[#allocation11 + $0x7d8] sm:$0xff] }
 0x213   :  { %1284 = vmatpush1.msra.mxu1 %v667_v20  ;;  %1361 = vmatpush1.msra.mxu0 %v923_v21  ;;  %v1076_v20 = vld [vmem:[#allocation11 + $0xfd8] sm:$0xff]  ;;  %v819_v21 = vld [vmem:[#allocation11 + $0x7d0] sm:$0xff] }
 0x214   :  { %1285 = vmatprep.subr.mxu1 %v660_v22  ;;  %1362 = vmatprep.subr.mxu0 %v916_v23  ;;  %v1075_v22 = vld [vmem:[#allocation11 + $0xfd0] sm:$0xff]  ;;  %v812_v23 = vld [vmem:[#allocation11 + $0x798] sm:$0xff] }
 0x215   :  { %1286 = vmatpush1.msra.mxu1 %v659_v24  ;;  %1363 = vmatpush1.msra.mxu0 %v915_v25  ;;  %v1068_v24 = vld [vmem:[#allocation11 + $0xf98] sm:$0xff]  ;;  %v811_v25 = vld [vmem:[#allocation11 + $0x790] sm:$0xff] }
 0x216   :  { %1287 = vmatprep.subr.mxu1 %v652_v26  ;;  %1364 = vmatprep.subr.mxu0 %v908_v27  ;;  %v1067_v26 = vld [vmem:[#allocation11 + $0xf90] sm:$0xff]  ;;  %v804_v27 = vld [vmem:[#allocation11 + $0x758] sm:$0xff] }
 0x217   :  { %1288 = vmatpush1.msra.mxu1 %v651_v28  ;;  %1365 = vmatpush1.msra.mxu0 %v907_v29  ;;  %v1060_v28 = vld [vmem:[#allocation11 + $0xf58] sm:$0xff]  ;;  %v803_v29 = vld [vmem:[#allocation11 + $0x750] sm:$0xff] }
 0x218   :  { %1289 = vmatprep.subr.mxu1 %v644_v30  ;;  %1366 = vmatprep.subr.mxu0 %v900_v31  ;;  %v1059_v30 = vld [vmem:[#allocation11 + $0xf50] sm:$0xff]  ;;  %v796_v31 = vld [vmem:[#allocation11 + $0x718] sm:$0xff] }
 0x219   :  { %1290 = vmatpush1.msra.mxu1 %v643_v32  ;;  %1367 = vmatpush1.msra.mxu0 %v899_v33  ;;  %v1052_v32 = vld [vmem:[#allocation11 + $0xf18] sm:$0xff]  ;;  %v795_v33 = vld [vmem:[#allocation11 + $0x710] sm:$0xff] }
 0x21a   :  { %1291 = vmatprep.subr.mxu1 %v636_v34  ;;  %1368 = vmatprep.subr.mxu0 %v892_v35  ;;  %v1051_v34 = vld [vmem:[#allocation11 + $0xf10] sm:$0xff]  ;;  %v788_v35 = vld [vmem:[#allocation11 + $0x6d8] sm:$0xff] }
 0x21b   :  { %1292 = vmatpush1.msra.mxu1 %v635_v36  ;;  %1369 = vmatpush1.msra.mxu0 %v891_v37  ;;  %v1044_v36 = vld [vmem:[#allocation11 + $0xed8] sm:$0xff]  ;;  %v787_v37 = vld [vmem:[#allocation11 + $0x6d0] sm:$0xff] }
 0x21c   :  { %1293 = vmatprep.subr.mxu1 %v628_v39  ;;  %1370 = vmatprep.subr.mxu0 %v884_v41  ;;  %v1043_v39 = vld [vmem:[#allocation11 + $0xed0] sm:$0xff]  ;;  %v780_v41 = vld [vmem:[#allocation11 + $0x698] sm:$0xff] }
 0x21d   :  { %1294 = vmatpush1.msra.mxu1 %v627_v42  ;;  %1371 = vmatpush1.msra.mxu0 %v883_v43  ;;  %v1036_v42 = vld [vmem:[#allocation11 + $0xe98] sm:$0xff]  ;;  %v779_v43 = vld [vmem:[#allocation11 + $0x690] sm:$0xff] }
 0x21e   :  { %1295 = vmatprep.subr.mxu1 %v620_v44  ;;  %1372 = vmatprep.subr.mxu0 %v876_v45  ;;  %v1035_v44 = vld [vmem:[#allocation11 + $0xe90] sm:$0xff]  ;;  %v772_v45 = vld [vmem:[#allocation11 + $0x658] sm:$0xff] }
 0x21f   :  { %1296 = vmatpush1.msra.mxu1 %v619_v46  ;;  %1373 = vmatpush1.msra.mxu0 %v875_v47  ;;  %v1028_v46 = vld [vmem:[#allocation11 + $0xe58] sm:$0xff]  ;;  %v771_v47 = vld [vmem:[#allocation11 + $0x650] sm:$0xff] }
 0x220   :  { %1297 = vmatprep.subr.mxu1 %v612_v48  ;;  %1374 = vmatprep.subr.mxu0 %v868_v49  ;;  %v1027_v48 = vld [vmem:[#allocation11 + $0xe50] sm:$0xff]  ;;  %v764_v49 = vld [vmem:[#allocation11 + $0x618] sm:$0xff] }
 0x221   :  { %1298 = vmatpush1.msra.mxu1 %v611_v50  ;;  %1375 = vmatpush1.msra.mxu0 %v867_v51  ;;  %v1020_v50 = vld [vmem:[#allocation11 + $0xe18] sm:$0xff]  ;;  %v763_v51 = vld [vmem:[#allocation11 + $0x610] sm:$0xff] }
 0x222   :  { %1299 = vmatprep.subr.mxu1 %v604_v52  ;;  %1376 = vmatprep.subr.mxu0 %v860_v53  ;;  %v1019_v52 = vld [vmem:[#allocation11 + $0xe10] sm:$0xff]  ;;  %v756_v53 = vld [vmem:[#allocation11 + $0x5d8] sm:$0xff] }
 0x223   :  { %1300 = vmatpush1.msra.mxu1 %v603_v54  ;;  %1377 = vmatpush1.msra.mxu0 %v859_v59  ;;  %v1012_v54 = vld [vmem:[#allocation11 + $0xdd8] sm:$0xff]  ;;  %v755_v59 = vld [vmem:[#allocation11 + $0x5d0] sm:$0xff] }
 0x224   :  { %1301 = vmatprep.subr.mxu1 %v596_v60  ;;  %1378 = vmatprep.subr.mxu0 %v852_v61  ;;  %v1011_v60 = vld [vmem:[#allocation11 + $0xdd0] sm:$0xff]  ;;  %v748_v61 = vld [vmem:[#allocation11 + $0x598] sm:$0xff] }
 0x225   :  { %1302 = vmatpush1.msra.mxu1 %v595_v62  ;;  %1379 = vmatpush1.msra.mxu0 %v851_v63  ;;  %v1004_v62 = vld [vmem:[#allocation11 + $0xd98] sm:$0xff]  ;;  %v747_v63 = vld [vmem:[#allocation11 + $0x590] sm:$0xff] }
 0x226   :  { %1303 = vmatprep.subr.mxu1 %v588_v0  ;;  %1380 = vmatprep.subr.mxu0 %v844_v1  ;;  %v1003_v0 = vld [vmem:[#allocation11 + $0xd90] sm:$0xff]  ;;  %v740_v1 = vld [vmem:[#allocation11 + $0x558] sm:$0xff] }
 0x227   :  { %1304 = vmatpush1.msra.mxu1 %v587_v2  ;;  %1381 = vmatpush1.msra.mxu0 %v843_v3  ;;  %v996_v2 = vld [vmem:[#allocation11 + $0xd58] sm:$0xff]  ;;  %v739_v3 = vld [vmem:[#allocation11 + $0x550] sm:$0xff] }
 0x228   :  { %1305 = vmatprep.subr.mxu1 %v580_v4  ;;  %1382 = vmatprep.subr.mxu0 %v836_v5  ;;  %v995_v4 = vld [vmem:[#allocation11 + $0xd50] sm:$0xff]  ;;  %v732_v5 = vld [vmem:[#allocation11 + $0x518] sm:$0xff] }
 0x229   :  { %1306 = vmatpush1.msra.mxu1 %v579_v6  ;;  %1383 = vmatpush1.msra.mxu0 %v835_v11  ;;  %v988_v6 = vld [vmem:[#allocation11 + $0xd18] sm:$0xff]  ;;  %v731_v11 = vld [vmem:[#allocation11 + $0x510] sm:$0xff] }
 0x22a   :  { %1307 = vmatprep.subr.mxu1 %v572_v12  ;;  %1384 = vmatprep.subr.mxu0 %v828_v13  ;;  %v987_v12 = vld [vmem:[#allocation11 + $0xd10] sm:$0xff]  ;;  %v724_v13 = vld [vmem:[#allocation11 + $0x4d8] sm:$0xff] }
 0x22b   :  { %1308 = vmatpush1.msra.mxu1 %v571_v16  ;;  %1385 = vmatpush1.msra.mxu0 %v827_v18  ;;  %v980_v16 = vld [vmem:[#allocation11 + $0xcd8] sm:$0xff]  ;;  %v723_v18 = vld [vmem:[#allocation11 + $0x4d0] sm:$0xff] }
 0x22c   :  { %1309 = vmatprep.subr.mxu1 %v820_v19  ;;  %1386 = vmatprep.subr.mxu0 %v1076_v20  ;;  %v979_v19 = vld [vmem:[#allocation11 + $0xcd0] sm:$0xff]  ;;  %v716_v20 = vld [vmem:[#allocation11 + $0x498] sm:$0xff] }
 0x22d   :  { %1310 = vmatpush2.msra.mxu1 %v819_v21  ;;  %1387 = vmatpush2.msra.mxu0 %v1075_v22  ;;  %v972_v21 = vld [vmem:[#allocation11 + $0xc98] sm:$0xff]  ;;  %v715_v22 = vld [vmem:[#allocation11 + $0x490] sm:$0xff] }
 0x22e   :  { %1311 = vmatprep.subr.mxu1 %v812_v23  ;;  %1388 = vmatprep.subr.mxu0 %v1068_v24  ;;  %v971_v23 = vld [vmem:[#allocation11 + $0xc90] sm:$0xff]  ;;  %v708_v24 = vld [vmem:[#allocation11 + $0x458] sm:$0xff] }
 0x22f   :  { %1312 = vmatpush2.msra.mxu1 %v811_v25  ;;  %1389 = vmatpush2.msra.mxu0 %v1067_v26  ;;  %v964_v25 = vld [vmem:[#allocation11 + $0xc58] sm:$0xff]  ;;  %v707_v26 = vld [vmem:[#allocation11 + $0x450] sm:$0xff] }
 0x230   :  { %1313 = vmatprep.subr.mxu1 %v804_v27  ;;  %1390 = vmatprep.subr.mxu0 %v1060_v28  ;;  %v963_v27 = vld [vmem:[#allocation11 + $0xc50] sm:$0xff]  ;;  %v700_v28 = vld [vmem:[#allocation11 + $0x418] sm:$0xff] }
 0x231   :  { %1314 = vmatpush2.msra.mxu1 %v803_v29  ;;  %1391 = vmatpush2.msra.mxu0 %v1059_v30  ;;  %v956_v29 = vld [vmem:[#allocation11 + $0xc18] sm:$0xff]  ;;  %v699_v30 = vld [vmem:[#allocation11 + $0x410] sm:$0xff] }
 0x232   :  { %1315 = vmatprep.subr.mxu1 %v796_v31  ;;  %1392 = vmatprep.subr.mxu0 %v1052_v32  ;;  %v955_v31 = vld [vmem:[#allocation11 + $0xc10] sm:$0xff]  ;;  %v694_v32 = vld [vmem:[#allocation11 + $0x3e8] sm:$0xff] }
 0x233   :  { %1316 = vmatpush2.msra.mxu1 %v795_v33  ;;  %1393 = vmatpush2.msra.mxu0 %v1051_v34  ;;  %v950_v33 = vld [vmem:[#allocation11 + $0xbe8] sm:$0xff]  ;;  %v693_v34 = vld [vmem:[#allocation11 + $0x3e0] sm:$0xff] }
 0x234   :  { %1317 = vmatprep.subr.mxu1 %v788_v35  ;;  %1394 = vmatprep.subr.mxu0 %v1044_v36  ;;  %v949_v35 = vld [vmem:[#allocation11 + $0xbe0] sm:$0xff]  ;;  %v686_v36 = vld [vmem:[#allocation11 + $0x3a8] sm:$0xff] }
 0x235   :  { %1318 = vmatpush2.msra.mxu1 %v787_v37  ;;  %1395 = vmatpush2.msra.mxu0 %v1043_v39  ;;  %v942_v37 = vld [vmem:[#allocation11 + $0xba8] sm:$0xff]  ;;  %v685_v39 = vld [vmem:[#allocation11 + $0x3a0] sm:$0xff] }
 0x236   :  { %1319 = vmatprep.subr.mxu1 %v780_v41  ;;  %1396 = vmatprep.subr.mxu0 %v1036_v42  ;;  %v941_v41 = vld [vmem:[#allocation11 + $0xba0] sm:$0xff]  ;;  %v678_v42 = vld [vmem:[#allocation11 + $0x368] sm:$0xff] }
 0x237   :  { %1320 = vmatpush2.msra.mxu1 %v779_v43  ;;  %1397 = vmatpush2.msra.mxu0 %v1035_v44  ;;  %v934_v43 = vld [vmem:[#allocation11 + $0xb68] sm:$0xff]  ;;  %v677_v44 = vld [vmem:[#allocation11 + $0x360] sm:$0xff] }
 0x238   :  { %1321 = vmatprep.subr.mxu1 %v772_v45  ;;  %1398 = vmatprep.subr.mxu0 %v1028_v46  ;;  %v933_v45 = vld [vmem:[#allocation11 + $0xb60] sm:$0xff]  ;;  %v670_v46 = vld [vmem:[#allocation11 + $0x328] sm:$0xff] }
 0x239   :  { %1322 = vmatpush2.msra.mxu1 %v771_v47  ;;  %1399 = vmatpush2.msra.mxu0 %v1027_v48  ;;  %v926_v47 = vld [vmem:[#allocation11 + $0xb28] sm:$0xff]  ;;  %v669_v48 = vld [vmem:[#allocation11 + $0x320] sm:$0xff] }
 0x23a   :  { %1323 = vmatprep.subr.mxu1 %v764_v49  ;;  %1400 = vmatprep.subr.mxu0 %v1020_v50  ;;  %v925_v49 = vld [vmem:[#allocation11 + $0xb20] sm:$0xff]  ;;  %v662_v50 = vld [vmem:[#allocation11 + $0x2e8] sm:$0xff] }
 0x23b   :  { %1324 = vmatpush2.msra.mxu1 %v763_v51  ;;  %1401 = vmatpush2.msra.mxu0 %v1019_v52  ;;  %v918_v51 = vld [vmem:[#allocation11 + $0xae8] sm:$0xff]  ;;  %v661_v52 = vld [vmem:[#allocation11 + $0x2e0] sm:$0xff] }
 0x23c   :  { %1325 = vmatprep.subr.mxu1 %v756_v53  ;;  %1402 = vmatprep.subr.mxu0 %v1012_v54  ;;  %v917_v53 = vld [vmem:[#allocation11 + $0xae0] sm:$0xff]  ;;  %v654_v54 = vld [vmem:[#allocation11 + $0x2a8] sm:$0xff] }
 0x23d   :  { %1326 = vmatpush2.msra.mxu1 %v755_v59  ;;  %1403 = vmatpush2.msra.mxu0 %v1011_v60  ;;  %v910_v59 = vld [vmem:[#allocation11 + $0xaa8] sm:$0xff]  ;;  %v653_v60 = vld [vmem:[#allocation11 + $0x2a0] sm:$0xff] }
 0x23e   :  { %1327 = vmatprep.subr.mxu1 %v748_v61  ;;  %1404 = vmatprep.subr.mxu0 %v1004_v62  ;;  %v909_v61 = vld [vmem:[#allocation11 + $0xaa0] sm:$0xff]  ;;  %v646_v62 = vld [vmem:[#allocation11 + $0x268] sm:$0xff] }
 0x23f   :  { %1328 = vmatpush2.msra.mxu1 %v747_v63  ;;  %1405 = vmatpush2.msra.mxu0 %v1003_v0  ;;  %v902_v63 = vld [vmem:[#allocation11 + $0xa68] sm:$0xff]  ;;  %v645_v0 = vld [vmem:[#allocation11 + $0x260] sm:$0xff] }
 0x240   :  { %1329 = vmatprep.subr.mxu1 %v740_v1  ;;  %1406 = vmatprep.subr.mxu0 %v996_v2  ;;  %v901_v1 = vld [vmem:[#allocation11 + $0xa60] sm:$0xff]  ;;  %v638_v2 = vld [vmem:[#allocation11 + $0x228] sm:$0xff] }
 0x241   :  { %1330 = vmatpush2.msra.mxu1 %v739_v3  ;;  %1407 = vmatpush2.msra.mxu0 %v995_v4  ;;  %v894_v3 = vld [vmem:[#allocation11 + $0xa28] sm:$0xff]  ;;  %v637_v4 = vld [vmem:[#allocation11 + $0x220] sm:$0xff] }
 0x242   :  { %1331 = vmatprep.subr.mxu1 %v732_v5  ;;  %1408 = vmatprep.subr.mxu0 %v988_v6  ;;  %v893_v5 = vld [vmem:[#allocation11 + $0xa20] sm:$0xff]  ;;  %v630_v6 = vld [vmem:[#allocation11 + $0x1e8] sm:$0xff] }
 0x243   :  { %1332 = vmatpush2.msra.mxu1 %v731_v11  ;;  %1409 = vmatpush2.msra.mxu0 %v987_v12  ;;  %v886_v11 = vld [vmem:[#allocation11 + $0x9e8] sm:$0xff]  ;;  %v629_v12 = vld [vmem:[#allocation11 + $0x1e0] sm:$0xff] }
 0x244   :  { %1333 = vmatprep.subr.mxu1 %v724_v13  ;;  %1410 = vmatprep.subr.mxu0 %v980_v16  ;;  %v885_v13 = vld [vmem:[#allocation11 + $0x9e0] sm:$0xff]  ;;  %v622_v16 = vld [vmem:[#allocation11 + $0x1a8] sm:$0xff] }
 0x245   :  { %1334 = vmatpush2.msra.mxu1 %v723_v18  ;;  %1411 = vmatpush2.msra.mxu0 %v979_v19  ;;  %v878_v18 = vld [vmem:[#allocation11 + $0x9a8] sm:$0xff]  ;;  %v621_v19 = vld [vmem:[#allocation11 + $0x1a0] sm:$0xff] }
 0x246   :  { %1335 = vmatprep.subr.mxu1 %v716_v20  ;;  %1412 = vmatprep.subr.mxu0 %v972_v21  ;;  %v877_v20 = vld [vmem:[#allocation11 + $0x9a0] sm:$0xff]  ;;  %v614_v21 = vld [vmem:[#allocation11 + $0x168] sm:$0xff] }
 0x247   :  { %1336 = vmatpush2.msra.mxu1 %v715_v22  ;;  %1413 = vmatpush2.msra.mxu0 %v971_v23  ;;  %v870_v22 = vld [vmem:[#allocation11 + $0x968] sm:$0xff]  ;;  %v613_v23 = vld [vmem:[#allocation11 + $0x160] sm:$0xff] }
 0x248   :  { %1337 = vmatprep.subr.mxu1 %v708_v24  ;;  %1414 = vmatprep.subr.mxu0 %v964_v25  ;;  %v869_v24 = vld [vmem:[#allocation11 + $0x960] sm:$0xff]  ;;  %v606_v25 = vld [vmem:[#allocation11 + $0x128] sm:$0xff] }
 0x249   :  { %1338 = vmatpush2.msra.mxu1 %v707_v26  ;;  %1415 = vmatpush2.msra.mxu0 %v963_v27  ;;  %v862_v26 = vld [vmem:[#allocation11 + $0x928] sm:$0xff]  ;;  %v605_v27 = vld [vmem:[#allocation11 + $0x120] sm:$0xff] }
 0x24a   :  { %1339 = vmatprep.subr.mxu1 %v700_v28  ;;  %1416 = vmatprep.subr.mxu0 %v956_v29  ;;  %v861_v28 = vld [vmem:[#allocation11 + $0x920] sm:$0xff]  ;;  %v598_v29 = vld [vmem:[#allocation11 + $0xe8] sm:$0xff] }
 0x24b   :  { %1340 = vmatpush2.msra.mxu1 %v699_v30  ;;  %1417 = vmatpush2.msra.mxu0 %v955_v31  ;;  %v854_v30 = vld [vmem:[#allocation11 + $0x8e8] sm:$0xff]  ;;  %v597_v31 = vld [vmem:[#allocation11 + $0xe0] sm:$0xff] }
 0x24c   :  { %1342 = vmatmul.mubr.f32.vlgmr.msra.gmra.mxu1 %v2725_v57  ;;  %1419 = vmatmul.mubr.f32.vlgmr.msra.gmra.mxu0 %v2727_v58 }
 0x24d   :  { %1431 = vmatprep.subr.mxu1 %v694_v32  ;;  %1508 = vmatprep.subr.mxu0 %v950_v33  ;;  %v853_v32 = vld [vmem:[#allocation11 + $0x8e0] sm:$0xff]  ;;  %v590_v33 = vld [vmem:[#allocation11 + $0xa8] sm:$0xff] }
 0x24e   :  { %1347 = vmatprep.mubr.f32.mxu1 %v2733_v7  ;;  %1424 = vmatprep.mubr.f32.mxu0 %v2735_v8 }
 0x24f   :  { %1432 = vmatpush1.msra.mxu1 %v693_v34  ;;  %1509 = vmatpush1.msra.mxu0 %v949_v35  ;;  %v846_v34 = vld [vmem:[#allocation11 + $0x8a8] sm:$0xff]  ;;  %v589_v35 = vld [vmem:[#allocation11 + $0xa0] sm:$0xff] }
 0x250   :  { %1433 = vmatprep.subr.mxu1 %v686_v36  ;;  %1510 = vmatprep.subr.mxu0 %v942_v37  ;;  %v845_v36 = vld [vmem:[#allocation11 + $0x8a0] sm:$0xff]  ;;  %v582_v37 = vld [vmem:[#allocation11 + $0x68] sm:$0xff] }
 0x251   :  { %1434 = vmatpush1.msra.mxu1 %v685_v39  ;;  %1511 = vmatpush1.msra.mxu0 %v941_v41  ;;  %v838_v39 = vld [vmem:[#allocation11 + $0x868] sm:$0xff]  ;;  %v581_v41 = vld [vmem:[#allocation11 + $0x60] sm:$0xff] }
 0x252   :  { %1348 = vmatmul.mubr.f32.gmra.mxu1 %v2737_v9  ;;  %1425 = vmatmul.mubr.f32.gmra.mxu0 %v2739_v10 }
 0x253   :  { %1435 = vmatprep.subr.mxu1 %v678_v42  ;;  %1512 = vmatprep.subr.mxu0 %v934_v43  ;;  %v837_v42 = vld [vmem:[#allocation11 + $0x860] sm:$0xff]  ;;  %v574_v43 = vld [vmem:[#allocation11 + $0x28] sm:$0xff] }
 0x254   :  { %1436 = vmatpush1.msra.mxu1 %v677_v44  ;;  %1495 = vmatprep.mubr.f32.mxu1 %v2721_v55  ;;  %v830_v44 = vld [vmem:[#allocation11 + $0x828] sm:$0xff] }
 0x255   :  { %1513 = vmatpush1.msra.mxu0 %v933_v45  ;;  %1572 = vmatprep.mubr.f32.mxu0 %v2723_v56  ;;  %v573_v45 = vld [vmem:[#allocation11 + $0x20] sm:$0xff] }
 0x256   :  { %1437 = vmatprep.subr.mxu1 %v670_v46  ;;  %1514 = vmatprep.subr.mxu0 %v926_v47  ;;  %v829_v46 = vld [vmem:[#allocation11 + $0x820] sm:$0xff]  ;;  %v822_v47 = vld [vmem:[#allocation11 + $0x7e8] sm:$0xff] }
 0x257   :  { %1438 = vmatpush1.msra.mxu1 %v669_v48  ;;  %1515 = vmatpush1.msra.mxu0 %v925_v49  ;;  %v1078_v48 = vld [vmem:[#allocation11 + $0xfe8] sm:$0xff]  ;;  %v821_v49 = vld [vmem:[#allocation11 + $0x7e0] sm:$0xff] }
 0x258   :  { %1439 = vmatprep.subr.mxu1 %v662_v50  ;;  %1516 = vmatprep.subr.mxu0 %v918_v51  ;;  %v1077_v50 = vld [vmem:[#allocation11 + $0xfe0] sm:$0xff]  ;;  %v814_v51 = vld [vmem:[#allocation11 + $0x7a8] sm:$0xff] }
 0x259   :  { %1440 = vmatpush1.msra.mxu1 %v661_v52  ;;  %1517 = vmatpush1.msra.mxu0 %v917_v53  ;;  %v1070_v52 = vld [vmem:[#allocation11 + $0xfa8] sm:$0xff]  ;;  %v813_v53 = vld [vmem:[#allocation11 + $0x7a0] sm:$0xff] }
 0x25a   :  { %1441 = vmatprep.subr.mxu1 %v654_v54  ;;  %1518 = vmatprep.subr.mxu0 %v910_v59  ;;  %v1069_v54 = vld [vmem:[#allocation11 + $0xfa0] sm:$0xff]  ;;  %v806_v59 = vld [vmem:[#allocation11 + $0x768] sm:$0xff] }
 0x25b   :  { %1442 = vmatpush1.msra.mxu1 %v653_v60  ;;  %1519 = vmatpush1.msra.mxu0 %v909_v61  ;;  %v1062_v60 = vld [vmem:[#allocation11 + $0xf68] sm:$0xff]  ;;  %v805_v61 = vld [vmem:[#allocation11 + $0x760] sm:$0xff] }
 0x25c   :  { %1443 = vmatprep.subr.mxu1 %v646_v62  ;;  %1520 = vmatprep.subr.mxu0 %v902_v63  ;;  %v1061_v62 = vld [vmem:[#allocation11 + $0xf60] sm:$0xff]  ;;  %v798_v63 = vld [vmem:[#allocation11 + $0x728] sm:$0xff] }
 0x25d   :  { %1444 = vmatpush1.msra.mxu1 %v645_v0  ;;  %1521 = vmatpush1.msra.mxu0 %v901_v1  ;;  %v1054_v0 = vld [vmem:[#allocation11 + $0xf28] sm:$0xff]  ;;  %v797_v1 = vld [vmem:[#allocation11 + $0x720] sm:$0xff] }
 0x25e   :  { %1445 = vmatprep.subr.mxu1 %v638_v2  ;;  %1522 = vmatprep.subr.mxu0 %v894_v3  ;;  %v1053_v2 = vld [vmem:[#allocation11 + $0xf20] sm:$0xff]  ;;  %v790_v3 = vld [vmem:[#allocation11 + $0x6e8] sm:$0xff] }
 0x25f   :  { %1446 = vmatpush1.msra.mxu1 %v637_v4  ;;  %1523 = vmatpush1.msra.mxu0 %v893_v5  ;;  %v1046_v4 = vld [vmem:[#allocation11 + $0xee8] sm:$0xff]  ;;  %v789_v5 = vld [vmem:[#allocation11 + $0x6e0] sm:$0xff] }
 0x260   :  { %1447 = vmatprep.subr.mxu1 %v630_v6  ;;  %1524 = vmatprep.subr.mxu0 %v886_v11  ;;  %v1045_v6 = vld [vmem:[#allocation11 + $0xee0] sm:$0xff]  ;;  %v782_v11 = vld [vmem:[#allocation11 + $0x6a8] sm:$0xff] }
 0x261   :  { %1448 = vmatpush1.msra.mxu1 %v629_v12  ;;  %1525 = vmatpush1.msra.mxu0 %v885_v13  ;;  %v1038_v12 = vld [vmem:[#allocation11 + $0xea8] sm:$0xff]  ;;  %v781_v13 = vld [vmem:[#allocation11 + $0x6a0] sm:$0xff] }
 0x262   :  { %1449 = vmatprep.subr.mxu1 %v622_v16  ;;  %1526 = vmatprep.subr.mxu0 %v878_v18  ;;  %v1037_v16 = vld [vmem:[#allocation11 + $0xea0] sm:$0xff]  ;;  %v774_v18 = vld [vmem:[#allocation11 + $0x668] sm:$0xff] }
 0x263   :  { %1450 = vmatpush1.msra.mxu1 %v621_v19  ;;  %1527 = vmatpush1.msra.mxu0 %v877_v20  ;;  %v1030_v19 = vld [vmem:[#allocation11 + $0xe68] sm:$0xff]  ;;  %v773_v20 = vld [vmem:[#allocation11 + $0x660] sm:$0xff] }
 0x264   :  { %1451 = vmatprep.subr.mxu1 %v614_v21  ;;  %1528 = vmatprep.subr.mxu0 %v870_v22  ;;  %v1029_v21 = vld [vmem:[#allocation11 + $0xe60] sm:$0xff]  ;;  %v766_v22 = vld [vmem:[#allocation11 + $0x628] sm:$0xff] }
 0x265   :  { %1452 = vmatpush1.msra.mxu1 %v613_v23  ;;  %1529 = vmatpush1.msra.mxu0 %v869_v24  ;;  %v1022_v23 = vld [vmem:[#allocation11 + $0xe28] sm:$0xff]  ;;  %v765_v24 = vld [vmem:[#allocation11 + $0x620] sm:$0xff] }
 0x266   :  { %1453 = vmatprep.subr.mxu1 %v606_v25  ;;  %1530 = vmatprep.subr.mxu0 %v862_v26  ;;  %v1021_v25 = vld [vmem:[#allocation11 + $0xe20] sm:$0xff]  ;;  %v758_v26 = vld [vmem:[#allocation11 + $0x5e8] sm:$0xff] }
 0x267   :  { %1454 = vmatpush1.msra.mxu1 %v605_v27  ;;  %1531 = vmatpush1.msra.mxu0 %v861_v28  ;;  %v1014_v27 = vld [vmem:[#allocation11 + $0xde8] sm:$0xff]  ;;  %v757_v28 = vld [vmem:[#allocation11 + $0x5e0] sm:$0xff] }
 0x268   :  { %1455 = vmatprep.subr.mxu1 %v598_v29  ;;  %1532 = vmatprep.subr.mxu0 %v854_v30  ;;  %v1013_v29 = vld [vmem:[#allocation11 + $0xde0] sm:$0xff]  ;;  %v750_v30 = vld [vmem:[#allocation11 + $0x5a8] sm:$0xff] }
 0x269   :  { %1456 = vmatpush1.msra.mxu1 %v597_v31  ;;  %1533 = vmatpush1.msra.mxu0 %v853_v32  ;;  %v1006_v31 = vld [vmem:[#allocation11 + $0xda8] sm:$0xff]  ;;  %v749_v32 = vld [vmem:[#allocation11 + $0x5a0] sm:$0xff] }
 0x26a   :  { %1457 = vmatprep.subr.mxu1 %v590_v33  ;;  %1534 = vmatprep.subr.mxu0 %v846_v34  ;;  %v1005_v33 = vld [vmem:[#allocation11 + $0xda0] sm:$0xff]  ;;  %v742_v34 = vld [vmem:[#allocation11 + $0x568] sm:$0xff] }
 0x26b   :  { %1458 = vmatpush1.msra.mxu1 %v589_v35  ;;  %1535 = vmatpush1.msra.mxu0 %v845_v36  ;;  %v998_v35 = vld [vmem:[#allocation11 + $0xd68] sm:$0xff]  ;;  %v741_v36 = vld [vmem:[#allocation11 + $0x560] sm:$0xff] }
 0x26c   :  { %1459 = vmatprep.subr.mxu1 %v582_v37  ;;  %1536 = vmatprep.subr.mxu0 %v838_v39  ;;  %v997_v37 = vld [vmem:[#allocation11 + $0xd60] sm:$0xff]  ;;  %v734_v39 = vld [vmem:[#allocation11 + $0x528] sm:$0xff] }
 0x26d   :  { %1460 = vmatpush1.msra.mxu1 %v581_v41  ;;  %1537 = vmatpush1.msra.mxu0 %v837_v42  ;;  %v990_v41 = vld [vmem:[#allocation11 + $0xd28] sm:$0xff]  ;;  %v733_v42 = vld [vmem:[#allocation11 + $0x520] sm:$0xff] }
 0x26e   :  { %1461 = vmatprep.subr.mxu1 %v574_v43  ;;  %1538 = vmatprep.subr.mxu0 %v830_v44  ;;  %v989_v43 = vld [vmem:[#allocation11 + $0xd20] sm:$0xff]  ;;  %v726_v44 = vld [vmem:[#allocation11 + $0x4e8] sm:$0xff] }
 0x26f   :  { %1462 = vmatpush1.msra.mxu1 %v573_v45  ;;  %1539 = vmatpush1.msra.mxu0 %v829_v46  ;;  %v982_v45 = vld [vmem:[#allocation11 + $0xce8] sm:$0xff]  ;;  %v725_v46 = vld [vmem:[#allocation11 + $0x4e0] sm:$0xff] }
 0x270   :  { %1463 = vmatprep.subr.mxu1 %v822_v47  ;;  %1540 = vmatprep.subr.mxu0 %v1078_v48  ;;  %v981_v47 = vld [vmem:[#allocation11 + $0xce0] sm:$0xff]  ;;  %v718_v48 = vld [vmem:[#allocation11 + $0x4a8] sm:$0xff] }
 0x271   :  { %1464 = vmatpush2.msra.mxu1 %v821_v49  ;;  %1541 = vmatpush2.msra.mxu0 %v1077_v50  ;;  %v974_v49 = vld [vmem:[#allocation11 + $0xca8] sm:$0xff]  ;;  %v717_v50 = vld [vmem:[#allocation11 + $0x4a0] sm:$0xff] }
 0x272   :  { %1465 = vmatprep.subr.mxu1 %v814_v51  ;;  %1542 = vmatprep.subr.mxu0 %v1070_v52  ;;  %v973_v51 = vld [vmem:[#allocation11 + $0xca0] sm:$0xff]  ;;  %v710_v52 = vld [vmem:[#allocation11 + $0x468] sm:$0xff] }
 0x273   :  { %1466 = vmatpush2.msra.mxu1 %v813_v53  ;;  %1543 = vmatpush2.msra.mxu0 %v1069_v54  ;;  %v966_v53 = vld [vmem:[#allocation11 + $0xc68] sm:$0xff]  ;;  %v709_v54 = vld [vmem:[#allocation11 + $0x460] sm:$0xff] }
 0x274   :  { %1467 = vmatprep.subr.mxu1 %v806_v59  ;;  %1544 = vmatprep.subr.mxu0 %v1062_v60  ;;  %v965_v59 = vld [vmem:[#allocation11 + $0xc60] sm:$0xff]  ;;  %v702_v60 = vld [vmem:[#allocation11 + $0x428] sm:$0xff] }
 0x275   :  { %1468 = vmatpush2.msra.mxu1 %v805_v61  ;;  %1545 = vmatpush2.msra.mxu0 %v1061_v62  ;;  %v958_v61 = vld [vmem:[#allocation11 + $0xc28] sm:$0xff]  ;;  %v701_v62 = vld [vmem:[#allocation11 + $0x420] sm:$0xff] }
 0x276   :  { %1469 = vmatprep.subr.mxu1 %v798_v63  ;;  %1546 = vmatprep.subr.mxu0 %v1054_v0  ;;  %v957_v63 = vld [vmem:[#allocation11 + $0xc20] sm:$0xff]  ;;  %v696_v0 = vld [vmem:[#allocation11 + $0x3f8] sm:$0xff] }
 0x277   :  { %1470 = vmatpush2.msra.mxu1 %v797_v1  ;;  %1547 = vmatpush2.msra.mxu0 %v1053_v2  ;;  %v952_v1 = vld [vmem:[#allocation11 + $0xbf8] sm:$0xff]  ;;  %v695_v2 = vld [vmem:[#allocation11 + $0x3f0] sm:$0xff] }
 0x278   :  { %1471 = vmatprep.subr.mxu1 %v790_v3  ;;  %1548 = vmatprep.subr.mxu0 %v1046_v4  ;;  %v951_v3 = vld [vmem:[#allocation11 + $0xbf0] sm:$0xff]  ;;  %v688_v4 = vld [vmem:[#allocation11 + $0x3b8] sm:$0xff] }
 0x279   :  { %1472 = vmatpush2.msra.mxu1 %v789_v5  ;;  %1549 = vmatpush2.msra.mxu0 %v1045_v6  ;;  %v944_v5 = vld [vmem:[#allocation11 + $0xbb8] sm:$0xff]  ;;  %v687_v6 = vld [vmem:[#allocation11 + $0x3b0] sm:$0xff] }
 0x27a   :  { %1473 = vmatprep.subr.mxu1 %v782_v11  ;;  %1550 = vmatprep.subr.mxu0 %v1038_v12  ;;  %v943_v11 = vld [vmem:[#allocation11 + $0xbb0] sm:$0xff]  ;;  %v680_v12 = vld [vmem:[#allocation11 + $0x378] sm:$0xff] }
 0x27b   :  { %1474 = vmatpush2.msra.mxu1 %v781_v13  ;;  %1551 = vmatpush2.msra.mxu0 %v1037_v16  ;;  %v936_v13 = vld [vmem:[#allocation11 + $0xb78] sm:$0xff]  ;;  %v679_v16 = vld [vmem:[#allocation11 + $0x370] sm:$0xff] }
 0x27c   :  { %1475 = vmatprep.subr.mxu1 %v774_v18  ;;  %1552 = vmatprep.subr.mxu0 %v1030_v19  ;;  %v935_v18 = vld [vmem:[#allocation11 + $0xb70] sm:$0xff]  ;;  %v672_v19 = vld [vmem:[#allocation11 + $0x338] sm:$0xff] }
 0x27d   :  { %1476 = vmatpush2.msra.mxu1 %v773_v20  ;;  %1553 = vmatpush2.msra.mxu0 %v1029_v21  ;;  %v928_v20 = vld [vmem:[#allocation11 + $0xb38] sm:$0xff]  ;;  %v671_v21 = vld [vmem:[#allocation11 + $0x330] sm:$0xff] }
 0x27e   :  { %1477 = vmatprep.subr.mxu1 %v766_v22  ;;  %1554 = vmatprep.subr.mxu0 %v1022_v23  ;;  %v927_v22 = vld [vmem:[#allocation11 + $0xb30] sm:$0xff]  ;;  %v664_v23 = vld [vmem:[#allocation11 + $0x2f8] sm:$0xff] }
 0x27f   :  { %1478 = vmatpush2.msra.mxu1 %v765_v24  ;;  %1555 = vmatpush2.msra.mxu0 %v1021_v25  ;;  %v920_v24 = vld [vmem:[#allocation11 + $0xaf8] sm:$0xff]  ;;  %v663_v25 = vld [vmem:[#allocation11 + $0x2f0] sm:$0xff] }
 0x280   :  { %1479 = vmatprep.subr.mxu1 %v758_v26  ;;  %1556 = vmatprep.subr.mxu0 %v1014_v27  ;;  %v919_v26 = vld [vmem:[#allocation11 + $0xaf0] sm:$0xff]  ;;  %v656_v27 = vld [vmem:[#allocation11 + $0x2b8] sm:$0xff] }
 0x281   :  { %1480 = vmatpush2.msra.mxu1 %v757_v28  ;;  %1557 = vmatpush2.msra.mxu0 %v1013_v29  ;;  %v912_v28 = vld [vmem:[#allocation11 + $0xab8] sm:$0xff]  ;;  %v655_v29 = vld [vmem:[#allocation11 + $0x2b0] sm:$0xff] }
 0x282   :  { %1481 = vmatprep.subr.mxu1 %v750_v30  ;;  %1558 = vmatprep.subr.mxu0 %v1006_v31  ;;  %v911_v30 = vld [vmem:[#allocation11 + $0xab0] sm:$0xff]  ;;  %v904_v31 = vld [vmem:[#allocation11 + $0xa78] sm:$0xff] }
 0x283   :  { %1482 = vmatpush2.msra.mxu1 %v749_v32  ;;  %1559 = vmatpush2.msra.mxu0 %v1005_v33  ;;  %v903_v32 = vld [vmem:[#allocation11 + $0xa70] sm:$0xff]  ;;  %v640_v33 = vld [vmem:[#allocation11 + $0x238] sm:$0xff] }
 0x284   :  { %1483 = vmatprep.subr.mxu1 %v742_v34  ;;  %1560 = vmatprep.subr.mxu0 %v998_v35  ;;  %v896_v34 = vld [vmem:[#allocation11 + $0xa38] sm:$0xff]  ;;  %v639_v35 = vld [vmem:[#allocation11 + $0x230] sm:$0xff] }
 0x285   :  { %1484 = vmatpush2.msra.mxu1 %v741_v36  ;;  %1561 = vmatpush2.msra.mxu0 %v997_v37  ;;  %v895_v36 = vld [vmem:[#allocation11 + $0xa30] sm:$0xff]  ;;  %v632_v37 = vld [vmem:[#allocation11 + $0x1f8] sm:$0xff] }
 0x286   :  { %1485 = vmatprep.subr.mxu1 %v734_v39  ;;  %1562 = vmatprep.subr.mxu0 %v990_v41  ;;  %v888_v39 = vld [vmem:[#allocation11 + $0x9f8] sm:$0xff]  ;;  %v631_v41 = vld [vmem:[#allocation11 + $0x1f0] sm:$0xff] }
 0x287   :  { %1486 = vmatpush2.msra.mxu1 %v733_v42  ;;  %1563 = vmatpush2.msra.mxu0 %v989_v43  ;;  %v887_v42 = vld [vmem:[#allocation11 + $0x9f0] sm:$0xff]  ;;  %v624_v43 = vld [vmem:[#allocation11 + $0x1b8] sm:$0xff] }
 0x288   :  { %1487 = vmatprep.subr.mxu1 %v726_v44  ;;  %1564 = vmatprep.subr.mxu0 %v982_v45  ;;  %v880_v44 = vld [vmem:[#allocation11 + $0x9b8] sm:$0xff]  ;;  %v623_v45 = vld [vmem:[#allocation11 + $0x1b0] sm:$0xff] }
 0x289   :  { %1488 = vmatpush2.msra.mxu1 %v725_v46  ;;  %1565 = vmatpush2.msra.mxu0 %v981_v47  ;;  %v879_v46 = vld [vmem:[#allocation11 + $0x9b0] sm:$0xff]  ;;  %v616_v47 = vld [vmem:[#allocation11 + $0x178] sm:$0xff] }
 0x28a   :  { %1489 = vmatprep.subr.mxu1 %v718_v48  ;;  %1566 = vmatprep.subr.mxu0 %v974_v49  ;;  %v872_v48 = vld [vmem:[#allocation11 + $0x978] sm:$0xff]  ;;  %v615_v49 = vld [vmem:[#allocation11 + $0x170] sm:$0xff] }
 0x28b   :  { %1490 = vmatpush2.msra.mxu1 %v717_v50  ;;  %1567 = vmatpush2.msra.mxu0 %v973_v51  ;;  %v871_v50 = vld [vmem:[#allocation11 + $0x970] sm:$0xff]  ;;  %v608_v51 = vld [vmem:[#allocation11 + $0x138] sm:$0xff] }
 0x28c   :  { %1491 = vmatprep.subr.mxu1 %v710_v52  ;;  %1568 = vmatprep.subr.mxu0 %v966_v53  ;;  %v864_v52 = vld [vmem:[#allocation11 + $0x938] sm:$0xff]  ;;  %v607_v53 = vld [vmem:[#allocation11 + $0x130] sm:$0xff] }
 0x28d   :  { %1492 = vmatpush2.msra.mxu1 %v709_v54  ;;  %1569 = vmatpush2.msra.mxu0 %v965_v59  ;;  %v863_v54 = vld [vmem:[#allocation11 + $0x930] sm:$0xff]  ;;  %v600_v59 = vld [vmem:[#allocation11 + $0xf8] sm:$0xff] }
 0x28e   :  { %1493 = vmatprep.subr.mxu1 %v702_v60  ;;  %1570 = vmatprep.subr.mxu0 %v958_v61  ;;  %v856_v60 = vld [vmem:[#allocation11 + $0x8f8] sm:$0xff]  ;;  %v599_v61 = vld [vmem:[#allocation11 + $0xf0] sm:$0xff] }
 0x28f   :  { %1494 = vmatpush2.msra.mxu1 %v701_v62  ;;  %1571 = vmatpush2.msra.mxu0 %v957_v63  ;;  %v855_v62 = vld [vmem:[#allocation11 + $0x8f0] sm:$0xff]  ;;  %v592_v63 = vld [vmem:[#allocation11 + $0xb8] sm:$0xff] }
 0x290   :  { %1496 = vmatmul.mubr.f32.vlgmr.msra.gmra.mxu1 %v2725_v57  ;;  %1573 = vmatmul.mubr.f32.vlgmr.msra.gmra.mxu0 %v2727_v58 }
 0x291   :  { %1585 = vmatprep.subr.mxu1 %v696_v0  ;;  %1662 = vmatprep.subr.mxu0 %v952_v1  ;;  %v848_v0 = vld [vmem:[#allocation11 + $0x8b8] sm:$0xff]  ;;  %v591_v1 = vld [vmem:[#allocation11 + $0xb0] sm:$0xff] }
 0x292   :  { %1501 = vmatprep.mubr.f32.mxu1 %v2733_v7  ;;  %1578 = vmatprep.mubr.f32.mxu0 %v2735_v8 }
 0x293   :  { %1586 = vmatpush1.msra.mxu1 %v695_v2  ;;  %1663 = vmatpush1.msra.mxu0 %v951_v3  ;;  %v847_v2 = vld [vmem:[#allocation11 + $0x8b0] sm:$0xff]  ;;  %v584_v3 = vld [vmem:[#allocation11 + $0x78] sm:$0xff] }
 0x294   :  { %1587 = vmatprep.subr.mxu1 %v688_v4  ;;  %1664 = vmatprep.subr.mxu0 %v944_v5  ;;  %v840_v4 = vld [vmem:[#allocation11 + $0x878] sm:$0xff]  ;;  %v583_v5 = vld [vmem:[#allocation11 + $0x70] sm:$0xff] }
 0x295   :  { %1588 = vmatpush1.msra.mxu1 %v687_v6  ;;  %1665 = vmatpush1.msra.mxu0 %v943_v11  ;;  %v839_v6 = vld [vmem:[#allocation11 + $0x870] sm:$0xff]  ;;  %v576_v11 = vld [vmem:[#allocation11 + $0x38] sm:$0xff] }
 0x296   :  { %1502 = vmatmul.mubr.f32.gmra.mxu1 %v2737_v9  ;;  %1579 = vmatmul.mubr.f32.gmra.mxu0 %v2739_v10 }
 0x297   :  { %1589 = vmatprep.subr.mxu1 %v680_v12  ;;  %1666 = vmatprep.subr.mxu0 %v936_v13  ;;  %v832_v12 = vld [vmem:[#allocation11 + $0x838] sm:$0xff]  ;;  %v575_v13 = vld [vmem:[#allocation11 + $0x30] sm:$0xff] }
 0x298   :  { %1590 = vmatpush1.msra.mxu1 %v679_v16  ;;  %1649 = vmatprep.mubr.f32.mxu1 %v2721_v55  ;;  %v648_v55 = vld [vmem:[#allocation11 + $0x278] sm:$0xff]  ;;  %v831_v16 = vld [vmem:[#allocation11 + $0x830] sm:$0xff] }
 0x299   :  { %1667 = vmatpush1.msra.mxu0 %v935_v18  ;;  %1726 = vmatprep.mubr.f32.mxu0 %v2723_v56  ;;  %v647_v56 = vld [vmem:[#allocation11 + $0x270] sm:$0xff]  ;;  %v824_v18 = vld [vmem:[#allocation11 + $0x7f8] sm:$0xff] }
 0x29a   :  { %1591 = vmatprep.subr.mxu1 %v672_v19  ;;  %1668 = vmatprep.subr.mxu0 %v928_v20  ;;  %v1080_v19 = vld [vmem:[#allocation11 + $0xff8] sm:$0xff]  ;;  %v823_v20 = vld [vmem:[#allocation11 + $0x7f0] sm:$0xff] }
 0x29b   :  { %1592 = vmatpush1.msra.mxu1 %v671_v21  ;;  %1669 = vmatpush1.msra.mxu0 %v927_v22  ;;  %v1079_v21 = vld [vmem:[#allocation11 + $0xff0] sm:$0xff]  ;;  %v816_v22 = vld [vmem:[#allocation11 + $0x7b8] sm:$0xff] }
 0x29c   :  { %1593 = vmatprep.subr.mxu1 %v664_v23  ;;  %1670 = vmatprep.subr.mxu0 %v920_v24  ;;  %v1072_v23 = vld [vmem:[#allocation11 + $0xfb8] sm:$0xff]  ;;  %v815_v24 = vld [vmem:[#allocation11 + $0x7b0] sm:$0xff] }
 0x29d   :  { %1594 = vmatpush1.msra.mxu1 %v663_v25  ;;  %1671 = vmatpush1.msra.mxu0 %v919_v26  ;;  %v1071_v25 = vld [vmem:[#allocation11 + $0xfb0] sm:$0xff]  ;;  %v808_v26 = vld [vmem:[#allocation11 + $0x778] sm:$0xff] }
 0x29e   :  { %1595 = vmatprep.subr.mxu1 %v656_v27  ;;  %1672 = vmatprep.subr.mxu0 %v912_v28  ;;  %v1064_v27 = vld [vmem:[#allocation11 + $0xf78] sm:$0xff]  ;;  %v807_v28 = vld [vmem:[#allocation11 + $0x770] sm:$0xff] }
 0x29f   :  { %1596 = vmatpush1.msra.mxu1 %v655_v29  ;;  %1673 = vmatpush1.msra.mxu0 %v911_v30  ;;  %v1063_v29 = vld [vmem:[#allocation11 + $0xf70] sm:$0xff]  ;;  %v800_v30 = vld [vmem:[#allocation11 + $0x738] sm:$0xff] }
 0x2a0   :  { %1597 = vmatprep.subr.mxu1 %v648_v55  ;;  %1674 = vmatprep.subr.mxu0 %v904_v31  ;;  %v1056_v55 = vld [vmem:[#allocation11 + $0xf38] sm:$0xff]  ;;  %v799_v31 = vld [vmem:[#allocation11 + $0x730] sm:$0xff] }
 0x2a1   :  { %1598 = vmatpush1.msra.mxu1 %v647_v56  ;;  %1675 = vmatpush1.msra.mxu0 %v903_v32  ;;  %v1055_v56 = vld [vmem:[#allocation11 + $0xf30] sm:$0xff]  ;;  %v792_v32 = vld [vmem:[#allocation11 + $0x6f8] sm:$0xff] }
 0x2a2   :  { %1599 = vmatprep.subr.mxu1 %v640_v33  ;;  %1676 = vmatprep.subr.mxu0 %v896_v34  ;;  %v1048_v33 = vld [vmem:[#allocation11 + $0xef8] sm:$0xff]  ;;  %v791_v34 = vld [vmem:[#allocation11 + $0x6f0] sm:$0xff] }
 0x2a3   :  { %1600 = vmatpush1.msra.mxu1 %v639_v35  ;;  %1677 = vmatpush1.msra.mxu0 %v895_v36  ;;  %v1047_v35 = vld [vmem:[#allocation11 + $0xef0] sm:$0xff]  ;;  %v784_v36 = vld [vmem:[#allocation11 + $0x6b8] sm:$0xff] }
 0x2a4   :  { %1601 = vmatprep.subr.mxu1 %v632_v37  ;;  %1678 = vmatprep.subr.mxu0 %v888_v39  ;;  %v1040_v37 = vld [vmem:[#allocation11 + $0xeb8] sm:$0xff]  ;;  %v783_v39 = vld [vmem:[#allocation11 + $0x6b0] sm:$0xff] }
 0x2a5   :  { %1602 = vmatpush1.msra.mxu1 %v631_v41  ;;  %1679 = vmatpush1.msra.mxu0 %v887_v42  ;;  %v1039_v41 = vld [vmem:[#allocation11 + $0xeb0] sm:$0xff]  ;;  %v776_v42 = vld [vmem:[#allocation11 + $0x678] sm:$0xff] }
 0x2a6   :  { %1603 = vmatprep.subr.mxu1 %v624_v43  ;;  %1680 = vmatprep.subr.mxu0 %v880_v44  ;;  %v1032_v43 = vld [vmem:[#allocation11 + $0xe78] sm:$0xff]  ;;  %v775_v44 = vld [vmem:[#allocation11 + $0x670] sm:$0xff] }
 0x2a7   :  { %1604 = vmatpush1.msra.mxu1 %v623_v45  ;;  %1681 = vmatpush1.msra.mxu0 %v879_v46  ;;  %v1031_v45 = vld [vmem:[#allocation11 + $0xe70] sm:$0xff]  ;;  %v768_v46 = vld [vmem:[#allocation11 + $0x638] sm:$0xff] }
 0x2a8   :  { %1605 = vmatprep.subr.mxu1 %v616_v47  ;;  %1682 = vmatprep.subr.mxu0 %v872_v48  ;;  %v1024_v47 = vld [vmem:[#allocation11 + $0xe38] sm:$0xff]  ;;  %v767_v48 = vld [vmem:[#allocation11 + $0x630] sm:$0xff] }
 0x2a9   :  { %1606 = vmatpush1.msra.mxu1 %v615_v49  ;;  %1683 = vmatpush1.msra.mxu0 %v871_v50  ;;  %v1023_v49 = vld [vmem:[#allocation11 + $0xe30] sm:$0xff]  ;;  %v760_v50 = vld [vmem:[#allocation11 + $0x5f8] sm:$0xff] }
 0x2aa   :  { %1607 = vmatprep.subr.mxu1 %v608_v51  ;;  %1684 = vmatprep.subr.mxu0 %v864_v52  ;;  %v1016_v51 = vld [vmem:[#allocation11 + $0xdf8] sm:$0xff]  ;;  %v759_v52 = vld [vmem:[#allocation11 + $0x5f0] sm:$0xff] }
 0x2ab   :  { %1608 = vmatpush1.msra.mxu1 %v607_v53  ;;  %1685 = vmatpush1.msra.mxu0 %v863_v54  ;;  %v1015_v53 = vld [vmem:[#allocation11 + $0xdf0] sm:$0xff]  ;;  %v752_v54 = vld [vmem:[#allocation11 + $0x5b8] sm:$0xff] }
 0x2ac   :  { %1609 = vmatprep.subr.mxu1 %v600_v59  ;;  %1686 = vmatprep.subr.mxu0 %v856_v60  ;;  %v1008_v59 = vld [vmem:[#allocation11 + $0xdb8] sm:$0xff]  ;;  %v751_v60 = vld [vmem:[#allocation11 + $0x5b0] sm:$0xff] }
 0x2ad   :  { %1610 = vmatpush1.msra.mxu1 %v599_v61  ;;  %1687 = vmatpush1.msra.mxu0 %v855_v62  ;;  %v1007_v61 = vld [vmem:[#allocation11 + $0xdb0] sm:$0xff]  ;;  %v744_v62 = vld [vmem:[#allocation11 + $0x578] sm:$0xff] }
 0x2ae   :  { %1611 = vmatprep.subr.mxu1 %v592_v63  ;;  %1688 = vmatprep.subr.mxu0 %v848_v0  ;;  %v1000_v63 = vld [vmem:[#allocation11 + $0xd78] sm:$0xff]  ;;  %v743_v0 = vld [vmem:[#allocation11 + $0x570] sm:$0xff] }
 0x2af   :  { %1612 = vmatpush1.msra.mxu1 %v591_v1  ;;  %1689 = vmatpush1.msra.mxu0 %v847_v2  ;;  %v999_v1 = vld [vmem:[#allocation11 + $0xd70] sm:$0xff]  ;;  %v736_v2 = vld [vmem:[#allocation11 + $0x538] sm:$0xff] }
 0x2b0   :  { %1613 = vmatprep.subr.mxu1 %v584_v3  ;;  %1690 = vmatprep.subr.mxu0 %v840_v4  ;;  %v992_v3 = vld [vmem:[#allocation11 + $0xd38] sm:$0xff]  ;;  %v735_v4 = vld [vmem:[#allocation11 + $0x530] sm:$0xff] }
 0x2b1   :  { %1614 = vmatpush1.msra.mxu1 %v583_v5  ;;  %1691 = vmatpush1.msra.mxu0 %v839_v6  ;;  %v991_v5 = vld [vmem:[#allocation11 + $0xd30] sm:$0xff]  ;;  %v728_v6 = vld [vmem:[#allocation11 + $0x4f8] sm:$0xff] }
 0x2b2   :  { %1615 = vmatprep.subr.mxu1 %v576_v11  ;;  %1692 = vmatprep.subr.mxu0 %v832_v12  ;;  %v984_v11 = vld [vmem:[#allocation11 + $0xcf8] sm:$0xff]  ;;  %v2763_v12 = vld [vmem:[#allocation13] sm:$0xff] }
 0x2b3   :  { %1616 = vmatpush1.msra.mxu1 %v575_v13  ;;  %1693 = vmatpush1.msra.mxu0 %v831_v16  ;;  %v727_v16 = vld [vmem:[#allocation11 + $0x4f0] sm:$0xff] }
 0x2b4   :  { %1617 = vmatprep.subr.mxu1 %v824_v18  ;;  %1694 = vmatprep.subr.mxu0 %v1080_v19  ;;  %v983_v18 = vld [vmem:[#allocation11 + $0xcf0] sm:$0xff]  ;;  %v2769_v19 = vrot.slane %v2763_v12, %v2709_v17 }
 0x2b5   :  { %1618 = vmatpush2.msra.mxu1 %v823_v20  ;;  %1695 = vmatpush2.msra.mxu0 %v1079_v21  ;;  %v720_v20 = vld [vmem:[#allocation11 + $0x4b8] sm:$0xff]  ;;  %v967_v17 = vld [vmem:[#allocation11 + $0xc70] sm:$0xff] }
 0x2b6   :  { %1619 = vmatprep.subr.mxu1 %v816_v22  ;;  %1696 = vmatprep.subr.mxu0 %v1072_v23  ;;  %v976_v21 = vld [vmem:[#allocation11 + $0xcb8] sm:$0xff]  ;;  %v719_v23 = vld [vmem:[#allocation11 + $0x4b0] sm:$0xff] }
 0x2b7   :  { %1620 = vmatpush2.msra.mxu1 %v815_v24  ;;  %1697 = vmatpush2.msra.mxu0 %v1071_v25  ;;  %v975_v24 = vld [vmem:[#allocation11 + $0xcb0] sm:$0xff]  ;;  %v712_v25 = vld [vmem:[#allocation11 + $0x478] sm:$0xff] }
 0x2b8   :  { %1621 = vmatprep.subr.mxu1 %v808_v26  ;;  %1698 = vmatprep.subr.mxu0 %v1064_v27  ;;  %v968_v26 = vld [vmem:[#allocation11 + $0xc78] sm:$0xff] }
 0x2b9   :  { %1622 = vmatpush2.msra.mxu1 %v807_v28  ;;  %1699 = vmatpush2.msra.mxu0 %v1063_v29  ;;  %v711_v28 = vld [vmem:[#allocation11 + $0x470] sm:$0xff] }
 0x2ba   :  { %1623 = vmatprep.subr.mxu1 %v800_v30  ;;  %1700 = vmatprep.subr.mxu0 %v1056_v55  ;;  %v704_v30 = vld [vmem:[#allocation11 + $0x438] sm:$0xff] }
 0x2bb   :  { %1624 = vmatpush2.msra.mxu1 %v799_v31  ;;  %1701 = vmatpush2.msra.mxu0 %v1055_v56  ;;  %v960_v55 = vld [vmem:[#allocation11 + $0xc38] sm:$0xff]  ;;  %v703_v31 = vld [vmem:[#allocation11 + $0x430] sm:$0xff] }
 0x2bc   :  { %1625 = vmatprep.subr.mxu1 %v792_v32  ;;  %1702 = vmatprep.subr.mxu0 %v1048_v33  ;;  %v959_v56 = vld [vmem:[#allocation11 + $0xc30] sm:$0xff]  ;;  %v1786_v33 = vld [vmem:[#allocation14 + $0xf8] sm:$0xff] }
 0x2bd   :  { %1626 = vmatpush2.msra.mxu1 %v791_v34  ;;  %1703 = vmatpush2.msra.mxu0 %v1047_v35  ;;  %v1770_v35 = vld [vmem:[#allocation14 + $0x78] sm:$0xff] }
 0x2be   :  { %1627 = vmatprep.subr.mxu1 %v784_v36  ;;  %1704 = vmatprep.subr.mxu0 %v1040_v37  ;;  %v1785_v36 = vld [vmem:[#allocation14 + $0xf0] sm:$0xff]  ;;  %v1818_v37 = vld [vmem:[#allocation14 + $0x1f8] sm:$0xff] }
 0x2bf   :  { %1628 = vmatpush2.msra.mxu1 %v783_v39  ;;  %1705 = vmatpush2.msra.mxu0 %v1039_v41  ;;  %v1769_v39 = vld [vmem:[#allocation14 + $0x70] sm:$0xff] }
 0x2c0   :  { %1629 = vmatprep.subr.mxu1 %v776_v42  ;;  %1706 = vmatprep.subr.mxu0 %v1032_v43  ;;  %v1784_v42 = vld [vmem:[#allocation14 + $0xe8] sm:$0xff] }
 0x2c1   :  { %1630 = vmatpush2.msra.mxu1 %v775_v44  ;;  %1707 = vmatpush2.msra.mxu0 %v1031_v45  ;;  %v1768_v43 = vld [vmem:[#allocation14 + $0x68] sm:$0xff]  ;;  %v1802_v44 = vld [vmem:[#allocation14 + $0x178] sm:$0xff]  ;;  %v1817_v45 = vld [vmem:[#allocation14 + $0x1f0] sm:$0xff] }
 0x2c2   :  { %1631 = vmatprep.subr.mxu1 %v768_v46  ;;  %1708 = vmatprep.subr.mxu0 %v1024_v47  ;;  %v1766_v46 = vld [vmem:[#allocation14 + $0x58] sm:$0xff]  ;;  %v1816_v47 = vld [vmem:[#allocation14 + $0x1e8] sm:$0xff] }
 0x2c3   :  { %1632 = vmatpush2.msra.mxu1 %v767_v48  ;;  %1709 = vmatpush2.msra.mxu0 %v1023_v49  ;;  %v1781_v48 = vld [vmem:[#allocation14 + $0xd0] sm:$0xff]  ;;  %v1800_v49 = vld [vmem:[#allocation14 + $0x168] sm:$0xff] }
 0x2c4   :  { %1633 = vmatprep.subr.mxu1 %v760_v50  ;;  %1710 = vmatprep.subr.mxu0 %v1016_v51  ;;  %v1815_v50 = vld [vmem:[#allocation14 + $0x1e0] sm:$0xff] }
 0x2c5   :  { %1634 = vmatpush2.msra.mxu1 %v759_v52  ;;  %1711 = vmatpush2.msra.mxu0 %v1015_v53  ;;  %v1799_v51 = vld [vmem:[#allocation14 + $0x160] sm:$0xff]  ;;  %v1764_v52 = vld [vmem:[#allocation14 + $0x48] sm:$0xff]  ;;  %v1814_v53 = vld [vmem:[#allocation14 + $0x1d8] sm:$0xff] }
 0x2c6   :  { %1635 = vmatprep.subr.mxu1 %v752_v54  ;;  %1712 = vmatprep.subr.mxu0 %v1008_v59  ;;  %v1779_v54 = vld [vmem:[#allocation14 + $0xc0] sm:$0xff]  ;;  %v1798_v59 = vld [vmem:[#allocation14 + $0x158] sm:$0xff] }
 0x2c7   :  { %1636 = vmatpush2.msra.mxu1 %v751_v60  ;;  %1713 = vmatpush2.msra.mxu0 %v1007_v61  ;;  %v1763_v60 = vld [vmem:[#allocation14 + $0x40] sm:$0xff]  ;;  %v1813_v61 = vld [vmem:[#allocation14 + $0x1d0] sm:$0xff] }
 0x2c8   :  { %1637 = vmatprep.subr.mxu1 %v744_v62  ;;  %1714 = vmatprep.subr.mxu0 %v1000_v63  ;;  %v1778_v62 = vld [vmem:[#allocation14 + $0xb8] sm:$0xff]  ;;  %v1797_v63 = vld [vmem:[#allocation14 + $0x150] sm:$0xff] }
 0x2c9   :  { %1638 = vmatpush2.msra.mxu1 %v743_v0  ;;  %1715 = vmatpush2.msra.mxu0 %v999_v1  ;;  %v2765_v13 = vpop.f32.mrf.mxu1  ;;  %v2771_v27 = vpop.f32.mrf.mxu0  ;;  %v1762_v0 = vld [vmem:[#allocation14 + $0x38] sm:$0xff] }
 0x2ca   :  { %1639 = vmatprep.subr.mxu1 %v736_v2  ;;  %1716 = vmatprep.subr.mxu0 %v992_v3  ;;  %v1812_v2 = vld [vmem:[#allocation14 + $0x1c8] sm:$0xff]  ;;  %v1777_v3 = vld [vmem:[#allocation14 + $0xb0] sm:$0xff] }
 0x2cb   :  { %1640 = vmatpush2.msra.mxu1 %v735_v4  ;;  %1717 = vmatpush2.msra.mxu0 %v991_v5  ;;  %v1191_v22 = vpop.f32.mrf.mxu1  ;;  %v1268_v32 = vpop.f32.mrf.mxu0  ;;  %v1796_v4 = vld [vmem:[#allocation14 + $0x148] sm:$0xff]  ;;  %v1761_v5 = vld [vmem:[#allocation14 + $0x30] sm:$0xff] }
 0x2cc   :  { %1641 = vmatprep.subr.mxu1 %v728_v6  ;;  %1718 = vmatprep.subr.mxu0 %v984_v11  ;;  %v1192_v29 = vadd.f32 %v1191_v22, %v2769_v19  ;;  %v1811_v6 = vld [vmem:[#allocation14 + $0x1c0] sm:$0xff]  ;;  %v1776_v11 = vld [vmem:[#allocation14 + $0xa8] sm:$0xff] }
 0x2cd   :  { %1642 = vmatpush2.msra.mxu1 %v727_v16  ;;  %1719 = vmatpush2.msra.mxu0 %v983_v18  ;;  %v1795_v16 = vld [vmem:[#allocation14 + $0x140] sm:$0xff]  ;;  %v1086_v18 = vrot.slane %v2763_v12, %v2706_v15  ;;  %v1793_v15 = vld [vmem:[#allocation14 + $0x130] sm:$0xff] }
 0x2ce   :  { %1643 = vmatprep.subr.mxu1 %v720_v20  ;;  %1720 = vmatprep.subr.mxu0 %v976_v21  ;;  %v1269_v34 = vadd.f32 %v1268_v32, %v1192_v29  ;;  %v1760_v20 = vld [vmem:[#allocation14 + $0x28] sm:$0xff]  ;;  %v1773_v32 = vld [vmem:[#allocation14 + $0x90] sm:$0xff] }
 0x2cf   :  { %1644 = vmatpush2.msra.mxu1 %v719_v23  ;;  %1721 = vmatpush2.msra.mxu0 %v975_v24  ;;  %v1195_v1 = vpop.f32.mrf.mxu1  ;;  %v1272_v22 = vpop.f32.mrf.mxu0  ;;  %v1810_v23 = vld [vmem:[#allocation14 + $0x1b8] sm:$0xff]  ;;  %v1775_v24 = vld [vmem:[#allocation14 + $0xa0] sm:$0xff] }
 0x2d0   :  { %1645 = vmatprep.subr.mxu1 %v712_v25  ;;  %1722 = vmatprep.subr.mxu0 %v968_v26  ;;  %v1740_v41 = vmax.f32 %v1269_v34, 0.0  ;;  %v1794_v25 = vld [vmem:[#allocation14 + $0x138] sm:$0xff]  ;;  %v1759_v26 = vld [vmem:[#allocation14 + $0x20] sm:$0xff]  ;;  %v1757_v34 = vld [vmem:[#allocation14 + $0x10] sm:$0xff] }
 0x2d1   :  { %1646 = vmatpush2.msra.mxu1 %v711_v28  ;;  %1723 = vmatpush2.msra.mxu0 %v967_v17  ;;  %v1197_v21 = vpop.f32.mrf.mxu1  ;;  %v1809_v28 = vld [vmem:[#allocation14 + $0x1b0] sm:$0xff]  ;;  %v1774_v17 = vld [vmem:[#allocation14 + $0x98] sm:$0xff] }
 0x2d2   :  { %1647 = vmatprep.subr.mxu1 %v704_v30  ;;  %1724 = vmatprep.subr.mxu0 %v960_v55  ;;  %v1198_v29 = vadd.f32 %v1197_v21, %v2769_v19  ;;  %v1190_v30 = vadd.f32 %v2765_v13, %v1086_v18  ;;  %v1758_v55 = vld [vmem:[#allocation14 + $0x18] sm:$0xff]  ;;  %v1772_v19 = vld [vmem:[#allocation14 + $0x88] sm:$0xff] }
 0x2d3   :  { %1648 = vmatpush2.msra.mxu1 %v703_v31  ;;  %1725 = vmatpush2.msra.mxu0 %v959_v56  ;;  %v1274_v31 = vpop.f32.mrf.mxu0  ;;  %v1808_v56 = vld [vmem:[#allocation14 + $0x1a8] sm:$0xff] }
 0x2d4   :  { %1650 = vmatmul.mubr.f32.vlgmr.msra.gmra.mxu1 %v2725_v57  ;;  %1727 = vmatmul.mubr.f32.vlgmr.msra.gmra.mxu0 %v2727_v58  ;;  %v1783_v57 = vld [vmem:[#allocation14 + $0xe0] sm:$0xff]  ;;  %v1267_v13 = vadd.f32 %v2771_v27, %v1190_v30  ;;  %v1804_v27 = vld [vmem:[#allocation14 + $0x188] sm:$0xff] }
 0x2d5   :  { %2216 = vmatprep.subr.mxu1 %v1786_v33  ;;  %1655 = vmatprep.mubr.f32.mxu1 %v2733_v7  ;;  %v1767_v58 = vld [vmem:[#allocation14 + $0x60] sm:$0xff]  ;;  %v1782_v7 = vld [vmem:[#allocation14 + $0xd8] sm:$0xff]  ;;  %v1792_v33 = vld [vmem:[#allocation14 + $0x128] sm:$0xff] }
 0x2d6   :  { %1732 = vmatprep.mubr.f32.mxu0 %v2735_v8  ;;  %2217 = vmatpush3.msra.mxu1 %v1770_v35  ;;  %v1801_v8 = vld [vmem:[#allocation14 + $0x170] sm:$0xff]  ;;  %v1196_v35 = vadd.f32 %v1195_v1, %v1086_v18  ;;  %v1840_v21 = vld [vmem:[#allocation14 + $0x2a8] sm:$0xff] }
 0x2d7   :  { %2218 = vmatprep.subr.mxu1 %v1785_v36  ;;  %2254 = vmatprep.subr.mxu0 %v1818_v37  ;;  %v1807_v36 = vld [vmem:[#allocation14 + $0x1a0] sm:$0xff]  ;;  %v1275_v37 = vadd.f32 %v1274_v31, %v1198_v29  ;;  %v1829_v1 = vld [vmem:[#allocation14 + $0x250] sm:$0xff]  ;;  %v1838_v29 = vld [vmem:[#allocation14 + $0x298] sm:$0xff] }
 0x2d8   :  { %2219 = vmatpush3.msra.mxu1 %v1769_v39  ;;  %1733 = vmatmul.mubr.f32.gmra.mxu0 %v2739_v10  ;;  %v1765_v10 = vld [vmem:[#allocation14 + $0x50] sm:$0xff]  ;;  %v1791_v39 = vld [vmem:[#allocation14 + $0x120] sm:$0xff] }
 0x2d9   :  { %1656 = vmatmul.mubr.f32.gmra.mxu1 %v2737_v9  ;;  %2220 = vmatprep.subr.mxu1 %v1784_v42  ;;  %v1780_v9 = vld [vmem:[#allocation14 + $0xc8] sm:$0xff]  ;;  %v1806_v42 = vld [vmem:[#allocation14 + $0x198] sm:$0xff]  ;;  %v1825_v18 = vld [vmem:[#allocation14 + $0x230] sm:$0xff] }
 0x2da   :  { %2221 = vmatpush3.msra.mxu1 %v1768_v43  ;;  %1954 = vmatprep.mubr.f32.mxu1 %v1740_v41  ;;  %v1756_v41 = vld [vmem:[#allocation14 + $0x8] sm:$0xff]  ;;  %v1771_v43 = vld [vmem:[#allocation14 + $0x80] sm:$0xff]  ;;  %v1837_v31 = vld [vmem:[#allocation14 + $0x290] sm:$0xff] }
 0x2db   :  { %2222 = vmatprep.subr.mxu1 %v1783_v57  ;;  %2255 = vmatpush3.msra.mxu0 %v1802_v44  ;;  %v1790_v57 = vld [vmem:[#allocation14 + $0x118] sm:$0xff]  ;;  %v1755_v44 = vld [vmem:[#allocation14] sm:$0xff] }
 0x2dc   :  { %2223 = vmatpush3.msra.mxu1 %v1767_v58  ;;  %2256 = vmatprep.subr.mxu0 %v1817_v45  ;;  %v1273_v58 = vadd.f32 %v1272_v22, %v1196_v35  ;;  %v1805_v45 = vld [vmem:[#allocation14 + $0x190] sm:$0xff]  ;;  %v1824_v22 = vld [vmem:[#allocation14 + $0x228] sm:$0xff] }
 0x2dd   :  { %2224 = vmatprep.subr.mxu1 %v1782_v7  ;;  %2257 = vmatpush3.msra.mxu0 %v1801_v8  ;;  %v1748_v7 = vmax.f32 %v1275_v37, 0.0  ;;  %v1789_v8 = vld [vmem:[#allocation14 + $0x110] sm:$0xff] }
 0x2de   :  { %2225 = vmatpush3.msra.mxu1 %v1766_v46  ;;  %2258 = vmatprep.subr.mxu0 %v1816_v47  ;;  %v1739_v46 = vmax.f32 %v1267_v13, 0.0  ;;  %v1788_v47 = vld [vmem:[#allocation14 + $0x108] sm:$0xff] }
 0x2df   :  { %2226 = vmatprep.subr.mxu1 %v1781_v48  ;;  %2259 = vmatpush3.msra.mxu0 %v1800_v49  ;;  %v1850_v48 = vld [vmem:[#allocation14 + $0x2f8] sm:$0xff]  ;;  %v1747_v49 = vmax.f32 %v1273_v58, 0.0 }
 0x2e0   :  { %2227 = vmatpush3.msra.mxu1 %v1765_v10  ;;  %2260 = vmatprep.subr.mxu0 %v1815_v50  ;;  %v1803_v10 = vld [vmem:[#allocation14 + $0x180] sm:$0xff]  ;;  %v1834_v50 = vld [vmem:[#allocation14 + $0x278] sm:$0xff] }
 0x2e1   :  { %2228 = vmatprep.subr.mxu1 %v1780_v9  ;;  %2261 = vmatpush3.msra.mxu0 %v1799_v51  ;;  %v1787_v9 = vld [vmem:[#allocation14 + $0x100] sm:$0xff]  ;;  %v1849_v51 = vld [vmem:[#allocation14 + $0x2f0] sm:$0xff] }
 0x2e2   :  { %2229 = vmatpush3.msra.mxu1 %v1764_v52  ;;  %2262 = vmatprep.subr.mxu0 %v1814_v53  ;;  %v1882_v52 = vld [vmem:[#allocation14 + $0x3f8] sm:$0xff]  ;;  %v1833_v53 = vld [vmem:[#allocation14 + $0x270] sm:$0xff] }
 0x2e3   :  { %2230 = vmatprep.subr.mxu1 %v1779_v54  ;;  %2263 = vmatpush3.msra.mxu0 %v1798_v59  ;;  %v1848_v54 = vld [vmem:[#allocation14 + $0x2e8] sm:$0xff] }
 0x2e4   :  { %2231 = vmatpush3.msra.mxu1 %v1763_v60  ;;  %2264 = vmatprep.subr.mxu0 %v1813_v61  ;;  %v1832_v59 = vld [vmem:[#allocation14 + $0x268] sm:$0xff]  ;;  %v1847_v60 = vld [vmem:[#allocation14 + $0x2e0] sm:$0xff] }
 0x2e5   :  { %2232 = vmatprep.subr.mxu1 %v1778_v62  ;;  %2265 = vmatpush3.msra.mxu0 %v1797_v63  ;;  %v1831_v61 = vld [vmem:[#allocation14 + $0x260] sm:$0xff]  ;;  %v1846_v62 = vld [vmem:[#allocation14 + $0x2d8] sm:$0xff] }
 0x2e6   :  { %2233 = vmatpush3.msra.mxu1 %v1762_v0  ;;  %2266 = vmatprep.subr.mxu0 %v1812_v2  ;;  %v1830_v63 = vld [vmem:[#allocation14 + $0x258] sm:$0xff]  ;;  %v1845_v0 = vld [vmem:[#allocation14 + $0x2d0] sm:$0xff]  ;;  %v1844_v2 = vld [vmem:[#allocation14 + $0x2c8] sm:$0xff] }
 0x2e7   :  { %2234 = vmatprep.subr.mxu1 %v1777_v3  ;;  %2267 = vmatpush3.msra.mxu0 %v1796_v4  ;;  %v1828_v3 = vld [vmem:[#allocation14 + $0x248] sm:$0xff]  ;;  %v1843_v4 = vld [vmem:[#allocation14 + $0x2c0] sm:$0xff] }
 0x2e8   :  { %2235 = vmatpush3.msra.mxu1 %v1761_v5  ;;  %2268 = vmatprep.subr.mxu0 %v1811_v6  ;;  %v1827_v5 = vld [vmem:[#allocation14 + $0x240] sm:$0xff]  ;;  %v1842_v6 = vld [vmem:[#allocation14 + $0x2b8] sm:$0xff] }
 0x2e9   :  { %2236 = vmatprep.subr.mxu1 %v1776_v11  ;;  %2269 = vmatpush3.msra.mxu0 %v1795_v16  ;;  %v1826_v11 = vld [vmem:[#allocation14 + $0x238] sm:$0xff]  ;;  %v1841_v16 = vld [vmem:[#allocation14 + $0x2b0] sm:$0xff] }
 0x2ea   :  { %2237 = vmatpush3.msra.mxu1 %v1760_v20  ;;  %2270 = vmatprep.subr.mxu0 %v1810_v23  ;;  %v1094_v20 = vrot.slane %v2763_v12, %v397_v38  ;;  %v1098_v23 = vrot.slane %v2763_v12, %v401_v40  ;;  %v1822_v38 = vld [vmem:[#allocation14 + $0x218] sm:$0xff] }
 0x2eb   :  { %2238 = vmatprep.subr.mxu1 %v1775_v24  ;;  %2271 = vmatpush3.msra.mxu0 %v1794_v25  ;;  %v1839_v24 = vld [vmem:[#allocation14 + $0x2a0] sm:$0xff] }
 0x2ec   :  { %2239 = vmatpush3.msra.mxu1 %v1759_v26  ;;  %2272 = vmatprep.subr.mxu0 %v1809_v28  ;;  %v1823_v28 = vld [vmem:[#allocation14 + $0x220] sm:$0xff] }
 0x2ed   :  { %2240 = vmatprep.subr.mxu1 %v1774_v17  ;;  %2273 = vmatpush3.msra.mxu0 %v1793_v15 }
 0x2ee   :  { %2241 = vmatpush3.msra.mxu1 %v1758_v55  ;;  %2274 = vmatprep.subr.mxu0 %v1808_v56 }
 0x2ef   :  { %2242 = vmatprep.subr.mxu1 %v1773_v32  ;;  %2275 = vmatpush3.msra.mxu0 %v1792_v33  ;;  %v1821_v32 = vld [vmem:[#allocation14 + $0x210] sm:$0xff]  ;;  %v1836_v33 = vld [vmem:[#allocation14 + $0x288] sm:$0xff] }
 0x2f0   :  { %2243 = vmatpush3.msra.mxu1 %v1757_v34  ;;  %2276 = vmatprep.subr.mxu0 %v1807_v36  ;;  %v1820_v36 = vld [vmem:[#allocation14 + $0x208] sm:$0xff] }
 0x2f1   :  { %2244 = vmatprep.subr.mxu1 %v1772_v19  ;;  %2277 = vmatpush3.msra.mxu0 %v1791_v39  ;;  %v1835_v39 = vld [vmem:[#allocation14 + $0x280] sm:$0xff] }
 0x2f2   :  { %2245 = vmatpush3.msra.mxu1 %v1756_v41  ;;  %2278 = vmatprep.subr.mxu0 %v1806_v42  ;;  %v1819_v42 = vld [vmem:[#allocation14 + $0x200] sm:$0xff] }
 0x2f3   :  { %2246 = vmatprep.subr.mxu1 %v1771_v43  ;;  %2279 = vmatpush3.msra.mxu0 %v1790_v57  ;;  %v1866_v43 = vld [vmem:[#allocation14 + $0x378] sm:$0xff] }
 0x2f4   :  { %2247 = vmatpush3.msra.mxu1 %v1755_v44  ;;  %2280 = vmatprep.subr.mxu0 %v1805_v45  ;;  %v1881_v44 = vld [vmem:[#allocation14 + $0x3f0] sm:$0xff] }
 0x2f5   :  { %1955 = vmatmul.mubr.f32.vlgmr.msra.gmra.mxu1 %v1739_v46  ;;  %2281 = vmatpush3.msra.mxu0 %v1789_v8  ;;  %v1880_v46 = vld [vmem:[#allocation14 + $0x3e8] sm:$0xff] }
 0x2f6   :  { %1959 = vmatprep.mubr.f32.mxu1 %v1748_v7  ;;  %2282 = vmatprep.subr.mxu0 %v1804_v27  ;;  %v1865_v7 = vld [vmem:[#allocation14 + $0x370] sm:$0xff]  ;;  %v1864_v27 = vld [vmem:[#allocation14 + $0x368] sm:$0xff] }
 0x2f7   :  { %2283 = vmatpush3.msra.mxu0 %v1788_v47  ;;  %2292 = vmatprep.subr.mxu1 %v1850_v48  ;;  %v1879_v48 = vld [vmem:[#allocation14 + $0x3e0] sm:$0xff] }
 0x2f8   :  { %2284 = vmatprep.subr.mxu0 %v1803_v10  ;;  %2293 = vmatpush3.msra.mxu1 %v1834_v50  ;;  %v1863_v10 = vld [vmem:[#allocation14 + $0x360] sm:$0xff]  ;;  %v1878_v50 = vld [vmem:[#allocation14 + $0x3d8] sm:$0xff] }
 0x2f9   :  { %1960 = vmatmul.mubr.f32.gmra.mxu1 %v1747_v49  ;;  %2285 = vmatpush3.msra.mxu0 %v1787_v9  ;;  %v1862_v9 = vld [vmem:[#allocation14 + $0x358] sm:$0xff] }
 0x2fa   :  { %2294 = vmatprep.subr.mxu1 %v1849_v51  ;;  %2330 = vmatprep.subr.mxu0 %v1882_v52  ;;  %v1877_v51 = vld [vmem:[#allocation14 + $0x3d0] sm:$0xff] }
 0x2fb   :  { %2295 = vmatpush3.msra.mxu1 %v1833_v53  ;;  %v1861_v52 = vld [vmem:[#allocation14 + $0x350] sm:$0xff]  ;;  %v1876_v53 = vld [vmem:[#allocation14 + $0x3c8] sm:$0xff] }
 0x2fc   :  { %2296 = vmatprep.subr.mxu1 %v1848_v54  ;;  %v1860_v54 = vld [vmem:[#allocation14 + $0x348] sm:$0xff] }
 0x2fd   :  { %2297 = vmatpush3.msra.mxu1 %v1832_v59  ;;  %v1875_v59 = vld [vmem:[#allocation14 + $0x3c0] sm:$0xff] }
 0x2fe   :  { %2298 = vmatprep.subr.mxu1 %v1847_v60  ;;  %v1859_v60 = vld [vmem:[#allocation14 + $0x340] sm:$0xff] }
 0x2ff   :  { %2299 = vmatpush3.msra.mxu1 %v1831_v61  ;;  %v1874_v61 = vld [vmem:[#allocation14 + $0x3b8] sm:$0xff] }
 0x300   :  { %2300 = vmatprep.subr.mxu1 %v1846_v62  ;;  %v1858_v62 = vld [vmem:[#allocation14 + $0x338] sm:$0xff] }
 0x301   :  { %2301 = vmatpush3.msra.mxu1 %v1830_v63  ;;  %v1873_v63 = vld [vmem:[#allocation14 + $0x3b0] sm:$0xff] }
 0x302   :  { %2302 = vmatprep.subr.mxu1 %v1845_v0  ;;  %v1857_v0 = vld [vmem:[#allocation14 + $0x330] sm:$0xff] }
 0x303   :  { %2303 = vmatpush3.msra.mxu1 %v1829_v1  ;;  %v1872_v1 = vld [vmem:[#allocation14 + $0x3a8] sm:$0xff] }
 0x304   :  { %2304 = vmatprep.subr.mxu1 %v1844_v2  ;;  %v1856_v2 = vld [vmem:[#allocation14 + $0x328] sm:$0xff] }
 0x305   :  { %2305 = vmatpush3.msra.mxu1 %v1828_v3  ;;  %v1871_v3 = vld [vmem:[#allocation14 + $0x3a0] sm:$0xff] }
 0x306   :  { %2306 = vmatprep.subr.mxu1 %v1843_v4  ;;  %v1855_v4 = vld [vmem:[#allocation14 + $0x320] sm:$0xff] }
 0x307   :  { %2307 = vmatpush3.msra.mxu1 %v1827_v5  ;;  %v1870_v5 = vld [vmem:[#allocation14 + $0x398] sm:$0xff] }
 0x308   :  { %2308 = vmatprep.subr.mxu1 %v1842_v6  ;;  %v1854_v6 = vld [vmem:[#allocation14 + $0x318] sm:$0xff] }
 0x309   :  { %2309 = vmatpush3.msra.mxu1 %v1826_v11  ;;  %v1869_v11 = vld [vmem:[#allocation14 + $0x390] sm:$0xff] }
 0x30a   :  { %2310 = vmatprep.subr.mxu1 %v1841_v16  ;;  %v1853_v16 = vld [vmem:[#allocation14 + $0x310] sm:$0xff] }
 0x30b   :  { %2311 = vmatpush3.msra.mxu1 %v1825_v18  ;;  %v1868_v18 = vld [vmem:[#allocation14 + $0x388] sm:$0xff] }
 0x30c   :  { %v1343_v25 = vpop.f32.mrf.mxu1  ;;  %v1420_v26 = vpop.f32.mrf.mxu0  ;;  %2312 = vmatprep.subr.mxu1 %v1840_v21  ;;  %v1867_v21 = vld [vmem:[#allocation14 + $0x380] sm:$0xff] }
 0x30d   :  { %v1344_v17 = vadd.f32 %v1343_v25, %v1094_v20  ;;  %2313 = vmatpush3.msra.mxu1 %v1824_v22  ;;  %v1851_v22 = vld [vmem:[#allocation14 + $0x300] sm:$0xff] }
 0x30e   :  { %v1345_v15 = vpop.f32.mrf.mxu1  ;;  %v1422_v30 = vpop.f32.mrf.mxu0  ;;  %2314 = vmatprep.subr.mxu1 %v1839_v24  ;;  %v1105_v24 = vsub.s32 5, %v2703_v14 }
 0x30f   :  { %v1346_v55 = vadd.f32 %v1345_v15, %v1098_v23  ;;  %2315 = vmatpush3.msra.mxu1 %v1823_v28  ;;  %v1421_v56 = vadd.f32 %v1420_v26, %v1344_v17 }
 0x310   :  { %2316 = vmatprep.subr.mxu1 %v1838_v29  ;;  %v1106_v26 = vrot.slane %v2763_v12, %v1105_v24 }
 0x311   :  { %v1423_v40 = vadd.f32 %v1422_v30, %v1346_v55  ;;  %2317 = vmatpush3.msra.mxu1 %v1822_v38  ;;  %v1741_v13 = vmax.f32 %v1421_v56, 0.0 }
 0x312   :  { %v1349_v34 = vpop.f32.mrf.mxu1  ;;  %v1426_v35 = vpop.f32.mrf.mxu0  ;;  %2318 = vmatprep.subr.mxu1 %v1837_v31 }
 0x313   :  { %v1742_v19 = vmax.f32 %v1423_v40, 0.0  ;;  %v1350_v37 = vadd.f32 %v1349_v34, %v1094_v20  ;;  %2319 = vmatpush3.msra.mxu1 %v1821_v32  ;;  %v1852_v20 = vld [vmem:[#allocation14 + $0x308] sm:$0xff] }
 0x314   :  { %v1351_v41 = vpop.f32.mrf.mxu1  ;;  %2320 = vmatprep.subr.mxu1 %v1836_v33  ;;  %v1428_v45 = vpop.f32.mrf.mxu0 }
 0x315   :  { %v1352_v57 = vadd.f32 %v1351_v41, %v1098_v23  ;;  %2029 = vmatprep.mubr.f32.mxu0 %v1742_v19  ;;  %2321 = vmatpush3.msra.mxu1 %v1820_v36  ;;  %v1427_v58 = vadd.f32 %v1426_v35, %v1350_v37  ;;  %v1101_v23 = vsub.s32 4, %v2703_v14 }
 0x316   :  { %2030 = vmatmul.mubr.f32.vlgmr.msra.gmra.mxu0 %v1741_v13  ;;  %2322 = vmatprep.subr.mxu1 %v1835_v39 }
 0x317   :  { %v1429_v8 = vadd.f32 %v1428_v45, %v1352_v57  ;;  %2323 = vmatpush3.msra.mxu1 %v1819_v42  ;;  %2331 = vmatpush3.msra.mxu0 %v1866_v43  ;;  %v1749_v49 = vmax.f32 %v1427_v58, 0.0  ;;  %v1102_v25 = vrot.slane %v2763_v12, %v1101_v23  ;;  %v1109_v42 = vsub.s32 6, %v2703_v14 }
 0x318   :  { %2332 = vmatprep.subr.mxu0 %v1881_v44  ;;  %v1113_v43 = vsub.s32 7, %v2703_v14 }
 0x319   :  { %v1750_v47 = vmax.f32 %v1429_v8, 0.0  ;;  %2333 = vmatpush3.msra.mxu0 %v1865_v7  ;;  %v1110_v57 = vrot.slane %v2763_v12, %v1109_v42 }
 0x31a   :  { %2334 = vmatprep.subr.mxu0 %v1880_v46  ;;  %v1114_v44 = vrot.slane %v2763_v12, %v1113_v43 }
 0x31b   :  { %2034 = vmatprep.mubr.f32.mxu0 %v1750_v47  ;;  %2335 = vmatpush3.msra.mxu0 %v1864_v27 }
 0x31c   :  { %2035 = vmatmul.mubr.f32.gmra.mxu0 %v1749_v49  ;;  %2336 = vmatprep.subr.mxu0 %v1879_v48 }
 0x31d   :  { %2337 = vmatpush3.msra.mxu0 %v1863_v10 }
 0x31e   :  { %2338 = vmatprep.subr.mxu0 %v1878_v50 }
 0x31f   :  { %2339 = vmatpush3.msra.mxu0 %v1862_v9 }
 0x320   :  { %2340 = vmatprep.subr.mxu0 %v1877_v51 }
 0x321   :  { %2341 = vmatpush3.msra.mxu0 %v1861_v52 }
 0x322   :  { %2342 = vmatprep.subr.mxu0 %v1876_v53 }
 0x323   :  { %2343 = vmatpush3.msra.mxu0 %v1860_v54 }
 0x324   :  { %2344 = vmatprep.subr.mxu0 %v1875_v59 }
 0x325   :  { %2345 = vmatpush3.msra.mxu0 %v1859_v60 }
 0x326   :  { %2346 = vmatprep.subr.mxu0 %v1874_v61 }
 0x327   :  { %2347 = vmatpush3.msra.mxu0 %v1858_v62 }
 0x328   :  { %2348 = vmatprep.subr.mxu0 %v1873_v63 }
 0x329   :  { %2349 = vmatpush3.msra.mxu0 %v1857_v0 }
 0x32a   :  { %2350 = vmatprep.subr.mxu0 %v1872_v1 }
 0x32b   :  { %2351 = vmatpush3.msra.mxu0 %v1856_v2 }
 0x32c   :  { %2352 = vmatprep.subr.mxu0 %v1871_v3 }
 0x32d   :  { %2353 = vmatpush3.msra.mxu0 %v1855_v4 }
 0x32e   :  { %2354 = vmatprep.subr.mxu0 %v1870_v5 }
 0x32f   :  { %2355 = vmatpush3.msra.mxu0 %v1854_v6 }
 0x330   :  { %2356 = vmatprep.subr.mxu0 %v1869_v11  ;;  %v2215_v11 = vld [vmem:[#allocation16] ss:$0 sm:$0xff] }
 0x331   :  { %2357 = vmatpush3.msra.mxu0 %v1853_v16 }
 0x332   :  { %2358 = vmatprep.subr.mxu0 %v1868_v18 }
 0x333   :  { %2359 = vmatpush3.msra.mxu0 %v1852_v20 }
 0x334   :  { %2360 = vmatprep.subr.mxu0 %v1867_v21 }
 0x335   :  { %2361 = vmatpush3.msra.mxu0 %v1851_v22 }
 0x350   :  { %v1497_v28 = vpop.f32.mrf.mxu1  ;;  %v1574_v17 = vpop.f32.mrf.mxu0 }
 0x351   :  { %v1498_v29 = vadd.f32 %v1497_v28, %v1102_v25 }
 0x352   :  { %v1499_v15 = vpop.f32.mrf.mxu1  ;;  %v1576_v30 = vpop.f32.mrf.mxu0 }
 0x353   :  { %v1500_v38 = vadd.f32 %v1499_v15, %v1106_v26  ;;  %v1575_v55 = vadd.f32 %v1574_v17, %v1498_v29 }
 0x355   :  { %v1577_v31 = vadd.f32 %v1576_v30, %v1500_v38  ;;  %v1743_v34 = vmax.f32 %v1575_v55, 0.0 }
 0x356   :  { %v1503_v56 = vpop.f32.mrf.mxu1  ;;  %v1580_v32 = vpop.f32.mrf.mxu0 }
 0x357   :  { %v1744_v40 = vmax.f32 %v1577_v31, 0.0  ;;  %v1504_v33 = vadd.f32 %v1503_v56, %v1102_v25 }
 0x358   :  { %v1505_v35 = vpop.f32.mrf.mxu1  ;;  %v1582_v37 = vpop.f32.mrf.mxu0 }
 0x359   :  { %v1506_v36 = vadd.f32 %v1505_v35, %v1106_v26  ;;  %2104 = vmatprep.mubr.f32.mxu1 %v1744_v40  ;;  %v1581_v19 = vadd.f32 %v1580_v32, %v1504_v33 }
 0x35a   :  { %2105 = vmatmul.mubr.f32.vlgmr.msra.gmra.mxu1 %v1743_v34 }
 0x35b   :  { %v1583_v39 = vadd.f32 %v1582_v37, %v1506_v36  ;;  %v1751_v41 = vmax.f32 %v1581_v19, 0.0 }
 0x35d   :  { %v1752_v13 = vmax.f32 %v1583_v39, 0.0 }
 0x35f   :  { %2109 = vmatprep.mubr.f32.mxu1 %v1752_v13 }
 0x360   :  { %2110 = vmatmul.mubr.f32.gmra.mxu1 %v1751_v41 }
 0x394   :  { %v1651_v58 = vpop.f32.mrf.mxu1  ;;  %v1728_v45 = vpop.f32.mrf.mxu0 }
 0x395   :  { %v1652_v7 = vadd.f32 %v1651_v58, %v1110_v57 }
 0x396   :  { %v1653_v8 = vpop.f32.mrf.mxu1  ;;  %v1730_v46 = vpop.f32.mrf.mxu0 }
 0x397   :  { %v1654_v27 = vadd.f32 %v1653_v8, %v1114_v44  ;;  %v1729_v47 = vadd.f32 %v1728_v45, %v1652_v7 }
 0x398   :  { %v1734_v10 = vpop.f32.mrf.mxu0 }
 0x399   :  { %v1731_v48 = vadd.f32 %v1730_v46, %v1654_v27  ;;  %v1657_v49 = vpop.f32.mrf.mxu1  ;;  %v1745_v52 = vmax.f32 %v1729_v47, 0.0 }
 0x39a   :  { %v1658_v50 = vadd.f32 %v1657_v49, %v1110_v57  ;;  %v1736_v54 = vpop.f32.mrf.mxu0 }
 0x39b   :  { %v1746_v9 = vmax.f32 %v1731_v48, 0.0  ;;  %v1659_v51 = vpop.f32.mrf.mxu1 }
 0x39c   :  { %v1660_v53 = vadd.f32 %v1659_v51, %v1114_v44  ;;  %v1735_v14 = vadd.f32 %v1734_v10, %v1658_v50 }
 0x39d   :  { %2179 = vmatprep.mubr.f32.mxu0 %v1746_v9 }
 0x39e   :  { %v1737_v59 = vadd.f32 %v1736_v54, %v1660_v53  ;;  %2180 = vmatmul.mubr.f32.vlgmr.msra.gmra.mxu0 %v1745_v52  ;;  %v1753_v60 = vmax.f32 %v1735_v14, 0.0 }
 0x3a0   :  { %v1754_v12 = vmax.f32 %v1737_v59, 0.0 }
 0x3a2   :  { %2184 = vmatprep.mubr.f32.mxu0 %v1754_v12 }
 0x3a3   :  { %2185 = vmatmul.mubr.f32.gmra.mxu0 %v1753_v60 }
 0x3b5   :  { %v2248_v61 = vpop.f32.mrf.mxu1 }
 0x3b7   :  { %v2249_v62 = vpop.f32.mrf.mxu1 }
 0x3b8   :  { %v2250_v6 = vadd.f32 %v2249_v62, %v2248_v61 }
 0x3b9   :  { %v2251_v63 = vpop.f32.mrf.mxu1 }
 0x3ba   :  { %v1957_v21 = vadd.f32 %v2250_v6, %v2215_v11 }
 0x3bb   :  { %v2252_v1 = vpop.f32.mrf.mxu1 }
 0x3bc   :  { %v2253_v23 = vadd.f32 %v2252_v1, %v2251_v63 }
 0x3be   :  { %v1962_v30 = vadd.f32 %v2253_v23, %v2215_v11 }
 0x3d6   :  { %v2286_v0 = vpop.f32.mrf.mxu0 }
 0x3d8   :  { %v2287_v3 = vpop.f32.mrf.mxu0 }
 0x3d9   :  { %v2288_v16 = vadd.f32 %v2287_v3, %v2286_v0 }
 0x3db   :  { %v2032_v25 = vadd.f32 %v2288_v16, %v1957_v21 }
 0x3dc   :  { %v2289_v5 = vpop.f32.mrf.mxu0 }
 0x3de   :  { %v2290_v20 = vpop.f32.mrf.mxu0 }
 0x3df   :  { %v2291_v28 = vadd.f32 %v2290_v20, %v2289_v5 }
 0x3e1   :  { %v2037_v56 = vadd.f32 %v2291_v28, %v1962_v30 }
 0x41a   :  { %v2324_v2 = vpop.f32.mrf.mxu1 }
 0x41c   :  { %v2325_v4 = vpop.f32.mrf.mxu1 }
 0x41d   :  { %v2326_v22 = vadd.f32 %v2325_v4, %v2324_v2 }
 0x41f   :  { %v2107_v29 = vadd.f32 %v2326_v22, %v2032_v25 }
 0x420   :  { %v2327_v18 = vpop.f32.mrf.mxu1 }
 0x422   :  { %v2328_v26 = vpop.f32.mrf.mxu1 }
 0x423   :  { %v2329_v38 = vadd.f32 %v2328_v26, %v2327_v18 }
 0x425   :  { %v2112_v40 = vadd.f32 %v2329_v38, %v2037_v56 }
 0x45e   :  { %v2362_v24 = vpop.f32.mrf.mxu0 }
 0x460   :  { %v2363_v17 = vpop.f32.mrf.mxu0 }
 0x461   :  { %v2364_v15 = vadd.f32 %v2363_v17, %v2362_v24 }
 0x463   :  { %v2182_v55 = vadd.f32 %v2364_v15, %v2107_v29  ;;  %v2365_v31 = vpop.f32.mrf.mxu0 }
 0x465   :  { %2190 = vst [vmem:[#allocation17] sm:$0xff] %v2182_v55  ;;  %v2366_v32 = vpop.f32.mrf.mxu0 }
 0x466   :  { %v2367_v33 = vadd.f32 %v2366_v32, %v2365_v31 }
 0x468   :  { %v2187_v34 = vadd.f32 %v2367_v33, %v2112_v40 }
 0x46a   :  { %2191 = vst [vmem:[#allocation17 + $0x8] sm:$0xff] %v2187_v34 }
 0x46b   :  { %2578 = shalt.err (!%p2575_p7)
}
 0x46c   :  { %2203 = dma.vmem_to_hbm [thread:$0]  %s2198_s8, 256, %s2814_s9, [#allocation4], %s2610_s12, %s2610_s12, %s2611_s13  }
 0x46d   :  { %2597 = dma.done.wait [#allocation4], 256  }
 0x46e   :  { %2598 = vsyncadd [#allocation4], 4294967040 }
 0x46f   :  { %2207 = vsyncpa [#allocation3], 1 }
 0x470   :  { %2208 = vsyncpa [#allocation6], 1 }
 0x471   :  { %2209 = vsyncpa [#allocation9], 1 }
 0x472   :  { %2210 = vsyncpa [#allocation12], 1 }
 0x473   :  { %2211 = vsyncpa [#allocation15], 1 }
 0x474   :  { %2212 = vsyncpa [#allocation4], 1 }

</bundles_post_ra>
